<compile_context>
chip_gen: v5e
topology: v5e:2x2
jax: 0.10.0
libtpu: 0.0.40
codegen_flags: <defaults>
</compile_context>

<pallas_src>
import functools

import jax
import jax.numpy as jnp
from jax.experimental import pallas as pl
from jax.experimental.pallas import tpu as pltpu

SUBLANES = 8  # batch padded to a full sublane tile


# ------------------------- Fused LSTM + FC kernel ----------------------------
def _fused_lstm_fc_kernel(num_layers, seq_len, batch_p, hidden, *refs):
    """refs = [xproj0, w_hh0_t, (w_ih_t, w_hh_t, bias) * (L-1),
               fc_w_t, fc_b, out, hseq_scratch]

    xproj0:  (T*Bp, 4H) f32  layer-0 input projection (embedding@W_ih0 + bias0
                             folded into the embedding table, gathered in the
                             wrapper); row t*Bp + b <=> timestep t, batch b.
    w_hh0_t: (H, 4H) f32     layer-0 recurrent weights.
    w_ih_t:  (H, 4H), w_hh_t: (H, 4H), bias: (1, 4H)   for layers 1..L-1.
    fc_w_t:  (H, C) f32,  fc_b: (1, C) f32
    out:     (Bp, C) f32
    hseq:    (T*Bp, H) f32 VMEM scratch holding one layer's hidden sequence.
    """
    T, Bp, H = seq_len, batch_p, hidden
    xproj0_ref = refs[0]
    whh0_ref = refs[1]
    w_refs = refs[2:2 + 3 * (num_layers - 1)]
    fcw_ref, fcb_ref, out_ref, hseq_sc = refs[2 + 3 * (num_layers - 1):]

    h = jnp.zeros((Bp, H), jnp.float32)
    for layer in range(num_layers):
        if layer == 0:
            xproj = xproj0_ref[...]                       # (T*Bp, 4H), bias folded
            w_hh = whh0_ref[...]                          # (H, 4H)
        else:
            w_ih = w_refs[3 * (layer - 1)][...]           # (H, 4H)
            w_hh = w_refs[3 * (layer - 1) + 1][...]       # (H, 4H)
            bias = w_refs[3 * (layer - 1) + 2][...]       # (1, 4H)
            # Hoisted input projection for the whole sequence: ONE MXU matmul.
            xproj = jnp.dot(hseq_sc[...], w_ih,
                            preferred_element_type=jnp.float32) + bias

        h = jnp.zeros((Bp, H), jnp.float32)
        c = jnp.zeros((Bp, H), jnp.float32)
        last_layer = layer == num_layers - 1

        # TODO(synk): W_hh could be held stationary in the MXU across the T
        # steps via pltpu.matmul_push_rhs/matmul_acc_lhs; kept as jnp.dot for
        # portability across v5e/v6e/v7x.
        for t in range(T):                                # static unroll (T small)
            # Sublane-aligned slice: rows t*Bp .. (t+1)*Bp-1, Bp == 8.
            gates = xproj[t * Bp:(t + 1) * Bp, :] + jnp.dot(
                h, w_hh, preferred_element_type=jnp.float32)         # (Bp, 4H)
            # Fused activations over the full (8,128) gates vreg:
            # 2 EUP passes here + tanh(c) below = 3/step (was 5).
            sig = jax.nn.sigmoid(gates)
            th = jnp.tanh(gates)
            i_g = sig[:, 0 * H:1 * H]
            f_g = sig[:, 1 * H:2 * H]
            g_g = th[:, 2 * H:3 * H]
            o_g = sig[:, 3 * H:4 * H]
            c = f_g * c + i_g * g_g
            h = o_g * jnp.tanh(c)
            if not last_layer:
                hseq_sc[t * Bp:(t + 1) * Bp, :] = h       # aligned store, stays in VMEM
        # Inter-layer dropout is identity in eval mode.

    # Dropout(eval) == identity; Linear head on the last timestep's hidden only.
    out_ref[...] = (jnp.dot(h, fcw_ref[...],
                            preferred_element_type=jnp.float32) + fcb_ref[...])


# ------------------------------- Model wrapper -------------------------------
def lstm_model_forward(params, token_ids):
    """token_ids: (B, T) int32  ->  logits (B, num_classes)."""
    B, T = token_ids.shape
    lstm = params["lstm"]
    num_layers = len(lstm)
    H = lstm[0][1].shape[0]                    # w_hh_t is (H, 4H)
    C = params["fc_w_t"].shape[1]
    Bp = -(-B // SUBLANES) * SUBLANES          # pad batch to sublane tile

    # Transpose the cheap int32 id matrix (not the f32 activations), pad the
    # batch with token 0, and gather the pre-projected embedding table:
    # layer-0 xproj comes straight out of the gather, no in-kernel matmul.
    ids = jnp.transpose(token_ids)                          # (T, B)
    ids = jnp.pad(ids, ((0, 0), (0, Bp - B)))               # (T, Bp)
    xproj0 = jnp.take(params["emb_proj"], ids, axis=0)      # (T, Bp, 4H)
    xproj0 = xproj0.reshape(T * Bp, 4 * H).astype(jnp.float32)

    inputs = [xproj0, lstm[0][1]]                           # layer-0 W_hh
    for (w_ih_t, w_hh_t, bias) in lstm[1:]:
        inputs += [w_ih_t, w_hh_t, bias]
    inputs += [params["fc_w_t"], params["fc_b"]]

    kernel = functools.partial(_fused_lstm_fc_kernel, num_layers, T, Bp, H)
    vmem_spec = pl.BlockSpec(memory_space=pltpu.MemorySpace.VMEM)
    out = pl.pallas_call(
        kernel,
        out_shape=jax.ShapeDtypeStruct((Bp, C), jnp.float32),
        in_specs=[vmem_spec] * len(inputs),
        out_specs=vmem_spec,
        scratch_shapes=[pltpu.VMEM((T * Bp, H), jnp.float32)],  # inter-layer h_seq
    )(*inputs)
    return out[:B]                                           # drop pad rows


# ---------------------------------- Init --------------------------------------
def init_params(key, vocab_size, embedding_dim, hidden_dim, num_layers, num_classes):
    """Deterministic init mimicking PyTorch shapes (Embedding ~ N(0,1),
    LSTM/Linear ~ U(-1/sqrt(H), 1/sqrt(H))).  Weights stored pre-transposed,
    biases pre-fused, and the layer-0 input projection folded into the
    embedding table (emb_proj), all once at init."""
    keys = jax.random.split(key, 2 + 4 * num_layers + 2)
    k = iter(keys)
    params = {}
    params["embedding"] = jax.random.normal(next(k), (vocab_size, embedding_dim),
                                            jnp.float32)
    bound = 1.0 / jnp.sqrt(hidden_dim)
    lstm = []
    for layer in range(num_layers):
        in_dim = embedding_dim if layer == 0 else hidden_dim
        w_ih = jax.random.uniform(next(k), (4 * hidden_dim, in_dim),
                                  jnp.float32, -bound, bound)
        w_hh = jax.random.uniform(next(k), (4 * hidden_dim, hidden_dim),
                                  jnp.float32, -bound, bound)
        b_ih = jax.random.uniform(next(k), (4 * hidden_dim,),
                                  jnp.float32, -bound, bound)
        b_hh = jax.random.uniform(next(k), (4 * hidden_dim,),
                                  jnp.float32, -bound, bound)
        lstm.append((jnp.asarray(w_ih.T),                       # (in_dim, 4H)
                     jnp.asarray(w_hh.T),                       # (H, 4H)
                     (b_ih + b_hh).reshape(1, 4 * hidden_dim))) # (1, 4H)
    params["lstm"] = lstm
    # Fold layer-0 input projection + bias into the embedding table.
    params["emb_proj"] = (params["embedding"] @ lstm[0][0]
                          + lstm[0][2])                          # (VOCAB, 4H)
    fc_w = jax.random.uniform(next(k), (num_classes, hidden_dim),
                              jnp.float32, -bound, bound)
    fc_b = jax.random.uniform(next(k), (num_classes,),
                              jnp.float32, -bound, bound)
    params["fc_w_t"] = jnp.asarray(fc_w.T)                      # (H, C)
    params["fc_b"] = fc_b.reshape(1, num_classes)               # (1, C)
    return params


# ------------------------------ Pure-JAX reference ---------------------------
def _reference_forward(params, token_ids):
    emb = jnp.take(params["embedding"], token_ids, axis=0)
    x = jnp.transpose(emb, (1, 0, 2)).astype(jnp.float32)        # (T, B, E)
    for (w_ih_t, w_hh_t, bias) in params["lstm"]:
        H = w_hh_t.shape[0]
        B = x.shape[1]
        h0 = jnp.zeros((B, H), jnp.float32)
        c0 = jnp.zeros((B, H), jnp.float32)

        def step(carry, xt, w_ih_t=w_ih_t, w_hh_t=w_hh_t, bias=bias, H=H):
            h, c = carry
            gates = xt @ w_ih_t + h @ w_hh_t + bias
            i = jax.nn.sigmoid(gates[:, 0 * H:1 * H])
            f = jax.nn.sigmoid(gates[:, 1 * H:2 * H])
            g = jnp.tanh(gates[:, 2 * H:3 * H])
            o = jax.nn.sigmoid(gates[:, 3 * H:4 * H])
            c = f * c + i * g
            h = o * jnp.tanh(c)
            return (h, c), h

        (_, _), hs = jax.lax.scan(step, (h0, c0), x)
        x = hs
    return x[-1] @ params["fc_w_t"] + params["fc_b"]


# ----------------------------------- Main ------------------------------------
if __name__ == "__main__":
    VOCAB, EMB, HID, LAYERS, CLASSES = 32, 16, 32, 2, 4
    B, T = 2, 8

    key = jax.random.PRNGKey(0)
    k_param, k_data = jax.random.split(key)
    params = init_params(k_param, VOCAB, EMB, HID, LAYERS, CLASSES)
    token_ids = jax.random.randint(k_data, (B, T), 0, VOCAB, dtype=jnp.int32)

    # TODO(synk): nn.Dropout is identity in eval mode; training-mode dropout
    # (random masking) is intentionally not emulated here.
    logits = jax.block_until_ready(lstm_model_forward(params, token_ids))
    ref = _reference_forward(params, token_ids)

    assert logits.shape == (B, CLASSES)
    assert jnp.allclose(logits, ref, rtol=1e-5, atol=1e-5), "mismatch vs reference"
    print("KERNEL_OK")
</pallas_src>

<mosaic_0001>
module attributes {stable_mosaic.version = 11 : i64} {
  func.func @_fused_lstm_fc_kernel(%arg0: memref<64x128xf32, #tpu.memory_space<vmem>>, %arg1: memref<32x128xf32, #tpu.memory_space<vmem>>, %arg2: memref<32x128xf32, #tpu.memory_space<vmem>>, %arg3: memref<32x128xf32, #tpu.memory_space<vmem>>, %arg4: memref<1x128xf32, #tpu.memory_space<vmem>>, %arg5: memref<32x4xf32, #tpu.memory_space<vmem>>, %arg6: memref<1x4xf32, #tpu.memory_space<vmem>>, %arg7: memref<8x4xf32, #tpu.memory_space<vmem>>, %arg8: memref<64x32xf32, #tpu.memory_space<vmem>>) attributes {dimension_semantics = [], scalar_prefetch = 0 : i64, scratch_operands = 1 : i64, tpu.core_type = #tpu.core_type<tc>} {
    %c0 = arith.constant 0 : index
    %c0_0 = arith.constant 0 : index
    %0 = vector.load %arg0[%c0, %c0_0] : memref<64x128xf32, #tpu.memory_space<vmem>>, vector<64x128xf32>
    %c0_1 = arith.constant 0 : index
    %c0_2 = arith.constant 0 : index
    %1 = vector.load %arg1[%c0_1, %c0_2] : memref<32x128xf32, #tpu.memory_space<vmem>>, vector<32x128xf32>
    %cst = arith.constant 0.000000e+00 : f32
    %2 = vector.broadcast %cst : f32 to vector<8x32xf32>
    %cst_3 = arith.constant 0.000000e+00 : f32
    %3 = vector.broadcast %cst_3 : f32 to vector<8x32xf32>
    %4 = vector.extract_strided_slice %0 {offsets = [0, 0], sizes = [8, 128], strides = [1, 1]} : vector<64x128xf32> to vector<8x128xf32>
    %cst_4 = arith.constant dense<0.000000e+00> : vector<8x128xf32>
    %5 = tpu.matmul %2, %1, %cst_4 {dimension_numbers = #tpu.dot_dimension_numbers<[1], [0], [0], [1], [0, 0, 1, 1], [], []>} : vector<8x32xf32>, vector<32x128xf32>, vector<8x128xf32> -> vector<8x128xf32>
    %6 = arith.addf %4, %5 : vector<8x128xf32>
    %7 = arith.negf %6 : vector<8x128xf32>
    %8 = math.exp %7 : vector<8x128xf32>
    %cst_5 = arith.constant 1.000000e+00 : f32
    %9 = vector.broadcast %cst_5 : f32 to vector<8x128xf32>
    %10 = arith.addf %9, %8 : vector<8x128xf32>
    %11 = arith.divf %9, %10 : vector<8x128xf32>
    %12 = math.tanh %6 : vector<8x128xf32>
    %13 = vector.extract_strided_slice %11 {offsets = [0, 0], sizes = [8, 32], strides = [1, 1]} : vector<8x128xf32> to vector<8x32xf32>
    %14 = vector.extract_strided_slice %11 {offsets = [0, 32], sizes = [8, 32], strides = [1, 1]} : vector<8x128xf32> to vector<8x32xf32>
    %15 = vector.extract_strided_slice %12 {offsets = [0, 64], sizes = [8, 32], strides = [1, 1]} : vector<8x128xf32> to vector<8x32xf32>
    %16 = vector.extract_strided_slice %11 {offsets = [0, 96], sizes = [8, 32], strides = [1, 1]} : vector<8x128xf32> to vector<8x32xf32>
    %17 = arith.mulf %14, %3 : vector<8x32xf32>
    %18 = arith.mulf %13, %15 : vector<8x32xf32>
    %19 = arith.addf %17, %18 : vector<8x32xf32>
    %20 = math.tanh %19 : vector<8x32xf32>
    %21 = arith.mulf %16, %20 : vector<8x32xf32>
    %c0_6 = arith.constant 0 : index
    %c0_7 = arith.constant 0 : index
    %22 = vector.load %arg8[%c0_6, %c0_7] : memref<64x32xf32, #tpu.memory_space<vmem>>, vector<8x32xf32>
    tpu.vector_store %arg8[%c0_6, %c0_7], %21 {strides = array<i32>} : memref<64x32xf32, #tpu.memory_space<vmem>>, vector<8x32xf32>,
    %23 = vector.extract_strided_slice %0 {offsets = [8, 0], sizes = [8, 128], strides = [1, 1]} : vector<64x128xf32> to vector<8x128xf32>
    %cst_8 = arith.constant dense<0.000000e+00> : vector<8x128xf32>
    %24 = tpu.matmul %21, %1, %cst_8 {dimension_numbers = #tpu.dot_dimension_numbers<[1], [0], [0], [1], [0, 0, 1, 1], [], []>} : vector<8x32xf32>, vector<32x128xf32>, vector<8x128xf32> -> vector<8x128xf32>
    %25 = arith.addf %23, %24 : vector<8x128xf32>
    %26 = arith.negf %25 : vector<8x128xf32>
    %27 = math.exp %26 : vector<8x128xf32>
    %cst_9 = arith.constant 1.000000e+00 : f32
    %28 = vector.broadcast %cst_9 : f32 to vector<8x128xf32>
    %29 = arith.addf %28, %27 : vector<8x128xf32>
    %30 = arith.divf %28, %29 : vector<8x128xf32>
    %31 = math.tanh %25 : vector<8x128xf32>
    %32 = vector.extract_strided_slice %30 {offsets = [0, 0], sizes = [8, 32], strides = [1, 1]} : vector<8x128xf32> to vector<8x32xf32>
    %33 = vector.extract_strided_slice %30 {offsets = [0, 32], sizes = [8, 32], strides = [1, 1]} : vector<8x128xf32> to vector<8x32xf32>
    %34 = vector.extract_strided_slice %31 {offsets = [0, 64], sizes = [8, 32], strides = [1, 1]} : vector<8x128xf32> to vector<8x32xf32>
    %35 = vector.extract_strided_slice %30 {offsets = [0, 96], sizes = [8, 32], strides = [1, 1]} : vector<8x128xf32> to vector<8x32xf32>
    %36 = arith.mulf %33, %19 : vector<8x32xf32>
    %37 = arith.mulf %32, %34 : vector<8x32xf32>
    %38 = arith.addf %36, %37 : vector<8x32xf32>
    %39 = math.tanh %38 : vector<8x32xf32>
    %40 = arith.mulf %35, %39 : vector<8x32xf32>
    %c8 = arith.constant 8 : index
    %c0_10 = arith.constant 0 : index
    %41 = vector.load %arg8[%c8, %c0_10] : memref<64x32xf32, #tpu.memory_space<vmem>>, vector<8x32xf32>
    tpu.vector_store %arg8[%c8, %c0_10], %40 {strides = array<i32>} : memref<64x32xf32, #tpu.memory_space<vmem>>, vector<8x32xf32>,
    %42 = vector.extract_strided_slice %0 {offsets = [16, 0], sizes = [8, 128], strides = [1, 1]} : vector<64x128xf32> to vector<8x128xf32>
    %cst_11 = arith.constant dense<0.000000e+00> : vector<8x128xf32>
    %43 = tpu.matmul %40, %1, %cst_11 {dimension_numbers = #tpu.dot_dimension_numbers<[1], [0], [0], [1], [0, 0, 1, 1], [], []>} : vector<8x32xf32>, vector<32x128xf32>, vector<8x128xf32> -> vector<8x128xf32>
    %44 = arith.addf %42, %43 : vector<8x128xf32>
    %45 = arith.negf %44 : vector<8x128xf32>
    %46 = math.exp %45 : vector<8x128xf32>
    %cst_12 = arith.constant 1.000000e+00 : f32
    %47 = vector.broadcast %cst_12 : f32 to vector<8x128xf32>
    %48 = arith.addf %47, %46 : vector<8x128xf32>
    %49 = arith.divf %47, %48 : vector<8x128xf32>
    %50 = math.tanh %44 : vector<8x128xf32>
    %51 = vector.extract_strided_slice %49 {offsets = [0, 0], sizes = [8, 32], strides = [1, 1]} : vector<8x128xf32> to vector<8x32xf32>
    %52 = vector.extract_strided_slice %49 {offsets = [0, 32], sizes = [8, 32], strides = [1, 1]} : vector<8x128xf32> to vector<8x32xf32>
    %53 = vector.extract_strided_slice %50 {offsets = [0, 64], sizes = [8, 32], strides = [1, 1]} : vector<8x128xf32> to vector<8x32xf32>
    %54 = vector.extract_strided_slice %49 {offsets = [0, 96], sizes = [8, 32], strides = [1, 1]} : vector<8x128xf32> to vector<8x32xf32>
    %55 = arith.mulf %52, %38 : vector<8x32xf32>
    %56 = arith.mulf %51, %53 : vector<8x32xf32>
    %57 = arith.addf %55, %56 : vector<8x32xf32>
    %58 = math.tanh %57 : vector<8x32xf32>
    %59 = arith.mulf %54, %58 : vector<8x32xf32>
    %c16 = arith.constant 16 : index
    %c0_13 = arith.constant 0 : index
    %60 = vector.load %arg8[%c16, %c0_13] : memref<64x32xf32, #tpu.memory_space<vmem>>, vector<8x32xf32>
    tpu.vector_store %arg8[%c16, %c0_13], %59 {strides = array<i32>} : memref<64x32xf32, #tpu.memory_space<vmem>>, vector<8x32xf32>,
    %61 = vector.extract_strided_slice %0 {offsets = [24, 0], sizes = [8, 128], strides = [1, 1]} : vector<64x128xf32> to vector<8x128xf32>
    %cst_14 = arith.constant dense<0.000000e+00> : vector<8x128xf32>
    %62 = tpu.matmul %59, %1, %cst_14 {dimension_numbers = #tpu.dot_dimension_numbers<[1], [0], [0], [1], [0, 0, 1, 1], [], []>} : vector<8x32xf32>, vector<32x128xf32>, vector<8x128xf32> -> vector<8x128xf32>
    %63 = arith.addf %61, %62 : vector<8x128xf32>
    %64 = arith.negf %63 : vector<8x128xf32>
    %65 = math.exp %64 : vector<8x128xf32>
    %cst_15 = arith.constant 1.000000e+00 : f32
    %66 = vector.broadcast %cst_15 : f32 to vector<8x128xf32>
    %67 = arith.addf %66, %65 : vector<8x128xf32>
    %68 = arith.divf %66, %67 : vector<8x128xf32>
    %69 = math.tanh %63 : vector<8x128xf32>
    %70 = vector.extract_strided_slice %68 {offsets = [0, 0], sizes = [8, 32], strides = [1, 1]} : vector<8x128xf32> to vector<8x32xf32>
    %71 = vector.extract_strided_slice %68 {offsets = [0, 32], sizes = [8, 32], strides = [1, 1]} : vector<8x128xf32> to vector<8x32xf32>
    %72 = vector.extract_strided_slice %69 {offsets = [0, 64], sizes = [8, 32], strides = [1, 1]} : vector<8x128xf32> to vector<8x32xf32>
    %73 = vector.extract_strided_slice %68 {offsets = [0, 96], sizes = [8, 32], strides = [1, 1]} : vector<8x128xf32> to vector<8x32xf32>
    %74 = arith.mulf %71, %57 : vector<8x32xf32>
    %75 = arith.mulf %70, %72 : vector<8x32xf32>
    %76 = arith.addf %74, %75 : vector<8x32xf32>
    %77 = math.tanh %76 : vector<8x32xf32>
    %78 = arith.mulf %73, %77 : vector<8x32xf32>
    %c24 = arith.constant 24 : index
    %c0_16 = arith.constant 0 : index
    %79 = vector.load %arg8[%c24, %c0_16] : memref<64x32xf32, #tpu.memory_space<vmem>>, vector<8x32xf32>
    tpu.vector_store %arg8[%c24, %c0_16], %78 {strides = array<i32>} : memref<64x32xf32, #tpu.memory_space<vmem>>, vector<8x32xf32>,
    %80 = vector.extract_strided_slice %0 {offsets = [32, 0], sizes = [8, 128], strides = [1, 1]} : vector<64x128xf32> to vector<8x128xf32>
    %cst_17 = arith.constant dense<0.000000e+00> : vector<8x128xf32>
    %81 = tpu.matmul %78, %1, %cst_17 {dimension_numbers = #tpu.dot_dimension_numbers<[1], [0], [0], [1], [0, 0, 1, 1], [], []>} : vector<8x32xf32>, vector<32x128xf32>, vector<8x128xf32> -> vector<8x128xf32>
    %82 = arith.addf %80, %81 : vector<8x128xf32>
    %83 = arith.negf %82 : vector<8x128xf32>
    %84 = math.exp %83 : vector<8x128xf32>
    %cst_18 = arith.constant 1.000000e+00 : f32
    %85 = vector.broadcast %cst_18 : f32 to vector<8x128xf32>
    %86 = arith.addf %85, %84 : vector<8x128xf32>
    %87 = arith.divf %85, %86 : vector<8x128xf32>
    %88 = math.tanh %82 : vector<8x128xf32>
    %89 = vector.extract_strided_slice %87 {offsets = [0, 0], sizes = [8, 32], strides = [1, 1]} : vector<8x128xf32> to vector<8x32xf32>
    %90 = vector.extract_strided_slice %87 {offsets = [0, 32], sizes = [8, 32], strides = [1, 1]} : vector<8x128xf32> to vector<8x32xf32>
    %91 = vector.extract_strided_slice %88 {offsets = [0, 64], sizes = [8, 32], strides = [1, 1]} : vector<8x128xf32> to vector<8x32xf32>
    %92 = vector.extract_strided_slice %87 {offsets = [0, 96], sizes = [8, 32], strides = [1, 1]} : vector<8x128xf32> to vector<8x32xf32>
    %93 = arith.mulf %90, %76 : vector<8x32xf32>
    %94 = arith.mulf %89, %91 : vector<8x32xf32>
    %95 = arith.addf %93, %94 : vector<8x32xf32>
    %96 = math.tanh %95 : vector<8x32xf32>
    %97 = arith.mulf %92, %96 : vector<8x32xf32>
    %c32 = arith.constant 32 : index
    %c0_19 = arith.constant 0 : index
    %98 = vector.load %arg8[%c32, %c0_19] : memref<64x32xf32, #tpu.memory_space<vmem>>, vector<8x32xf32>
    tpu.vector_store %arg8[%c32, %c0_19], %97 {strides = array<i32>} : memref<64x32xf32, #tpu.memory_space<vmem>>, vector<8x32xf32>,
    %99 = vector.extract_strided_slice %0 {offsets = [40, 0], sizes = [8, 128], strides = [1, 1]} : vector<64x128xf32> to vector<8x128xf32>
    %cst_20 = arith.constant dense<0.000000e+00> : vector<8x128xf32>
    %100 = tpu.matmul %97, %1, %cst_20 {dimension_numbers = #tpu.dot_dimension_numbers<[1], [0], [0], [1], [0, 0, 1, 1], [], []>} : vector<8x32xf32>, vector<32x128xf32>, vector<8x128xf32> -> vector<8x128xf32>
    %101 = arith.addf %99, %100 : vector<8x128xf32>
    %102 = arith.negf %101 : vector<8x128xf32>
    %103 = math.exp %102 : vector<8x128xf32>
    %cst_21 = arith.constant 1.000000e+00 : f32
    %104 = vector.broadcast %cst_21 : f32 to vector<8x128xf32>
    %105 = arith.addf %104, %103 : vector<8x128xf32>
    %106 = arith.divf %104, %105 : vector<8x128xf32>
    %107 = math.tanh %101 : vector<8x128xf32>
    %108 = vector.extract_strided_slice %106 {offsets = [0, 0], sizes = [8, 32], strides = [1, 1]} : vector<8x128xf32> to vector<8x32xf32>
    %109 = vector.extract_strided_slice %106 {offsets = [0, 32], sizes = [8, 32], strides = [1, 1]} : vector<8x128xf32> to vector<8x32xf32>
    %110 = vector.extract_strided_slice %107 {offsets = [0, 64], sizes = [8, 32], strides = [1, 1]} : vector<8x128xf32> to vector<8x32xf32>
    %111 = vector.extract_strided_slice %106 {offsets = [0, 96], sizes = [8, 32], strides = [1, 1]} : vector<8x128xf32> to vector<8x32xf32>
    %112 = arith.mulf %109, %95 : vector<8x32xf32>
    %113 = arith.mulf %108, %110 : vector<8x32xf32>
    %114 = arith.addf %112, %113 : vector<8x32xf32>
    %115 = math.tanh %114 : vector<8x32xf32>
    %116 = arith.mulf %111, %115 : vector<8x32xf32>
    %c40 = arith.constant 40 : index
    %c0_22 = arith.constant 0 : index
    %117 = vector.load %arg8[%c40, %c0_22] : memref<64x32xf32, #tpu.memory_space<vmem>>, vector<8x32xf32>
    tpu.vector_store %arg8[%c40, %c0_22], %116 {strides = array<i32>} : memref<64x32xf32, #tpu.memory_space<vmem>>, vector<8x32xf32>,
    %118 = vector.extract_strided_slice %0 {offsets = [48, 0], sizes = [8, 128], strides = [1, 1]} : vector<64x128xf32> to vector<8x128xf32>
    %cst_23 = arith.constant dense<0.000000e+00> : vector<8x128xf32>
    %119 = tpu.matmul %116, %1, %cst_23 {dimension_numbers = #tpu.dot_dimension_numbers<[1], [0], [0], [1], [0, 0, 1, 1], [], []>} : vector<8x32xf32>, vector<32x128xf32>, vector<8x128xf32> -> vector<8x128xf32>
    %120 = arith.addf %118, %119 : vector<8x128xf32>
    %121 = arith.negf %120 : vector<8x128xf32>
    %122 = math.exp %121 : vector<8x128xf32>
    %cst_24 = arith.constant 1.000000e+00 : f32
    %123 = vector.broadcast %cst_24 : f32 to vector<8x128xf32>
    %124 = arith.addf %123, %122 : vector<8x128xf32>
    %125 = arith.divf %123, %124 : vector<8x128xf32>
    %126 = math.tanh %120 : vector<8x128xf32>
    %127 = vector.extract_strided_slice %125 {offsets = [0, 0], sizes = [8, 32], strides = [1, 1]} : vector<8x128xf32> to vector<8x32xf32>
    %128 = vector.extract_strided_slice %125 {offsets = [0, 32], sizes = [8, 32], strides = [1, 1]} : vector<8x128xf32> to vector<8x32xf32>
    %129 = vector.extract_strided_slice %126 {offsets = [0, 64], sizes = [8, 32], strides = [1, 1]} : vector<8x128xf32> to vector<8x32xf32>
    %130 = vector.extract_strided_slice %125 {offsets = [0, 96], sizes = [8, 32], strides = [1, 1]} : vector<8x128xf32> to vector<8x32xf32>
    %131 = arith.mulf %128, %114 : vector<8x32xf32>
    %132 = arith.mulf %127, %129 : vector<8x32xf32>
    %133 = arith.addf %131, %132 : vector<8x32xf32>
    %134 = math.tanh %133 : vector<8x32xf32>
    %135 = arith.mulf %130, %134 : vector<8x32xf32>
    %c48 = arith.constant 48 : index
    %c0_25 = arith.constant 0 : index
    %136 = vector.load %arg8[%c48, %c0_25] : memref<64x32xf32, #tpu.memory_space<vmem>>, vector<8x32xf32>
    tpu.vector_store %arg8[%c48, %c0_25], %135 {strides = array<i32>} : memref<64x32xf32, #tpu.memory_space<vmem>>, vector<8x32xf32>,
    %137 = vector.extract_strided_slice %0 {offsets = [56, 0], sizes = [8, 128], strides = [1, 1]} : vector<64x128xf32> to vector<8x128xf32>
    %cst_26 = arith.constant dense<0.000000e+00> : vector<8x128xf32>
    %138 = tpu.matmul %135, %1, %cst_26 {dimension_numbers = #tpu.dot_dimension_numbers<[1], [0], [0], [1], [0, 0, 1, 1], [], []>} : vector<8x32xf32>, vector<32x128xf32>, vector<8x128xf32> -> vector<8x128xf32>
    %139 = arith.addf %137, %138 : vector<8x128xf32>
    %140 = arith.negf %139 : vector<8x128xf32>
    %141 = math.exp %140 : vector<8x128xf32>
    %cst_27 = arith.constant 1.000000e+00 : f32
    %142 = vector.broadcast %cst_27 : f32 to vector<8x128xf32>
    %143 = arith.addf %142, %141 : vector<8x128xf32>
    %144 = arith.divf %142, %143 : vector<8x128xf32>
    %145 = math.tanh %139 : vector<8x128xf32>
    %146 = vector.extract_strided_slice %144 {offsets = [0, 0], sizes = [8, 32], strides = [1, 1]} : vector<8x128xf32> to vector<8x32xf32>
    %147 = vector.extract_strided_slice %144 {offsets = [0, 32], sizes = [8, 32], strides = [1, 1]} : vector<8x128xf32> to vector<8x32xf32>
    %148 = vector.extract_strided_slice %145 {offsets = [0, 64], sizes = [8, 32], strides = [1, 1]} : vector<8x128xf32> to vector<8x32xf32>
    %149 = vector.extract_strided_slice %144 {offsets = [0, 96], sizes = [8, 32], strides = [1, 1]} : vector<8x128xf32> to vector<8x32xf32>
    %150 = arith.mulf %147, %133 : vector<8x32xf32>
    %151 = arith.mulf %146, %148 : vector<8x32xf32>
    %152 = arith.addf %150, %151 : vector<8x32xf32>
    %153 = math.tanh %152 : vector<8x32xf32>
    %154 = arith.mulf %149, %153 : vector<8x32xf32>
    %c56 = arith.constant 56 : index
    %c0_28 = arith.constant 0 : index
    %155 = vector.load %arg8[%c56, %c0_28] : memref<64x32xf32, #tpu.memory_space<vmem>>, vector<8x32xf32>
    tpu.vector_store %arg8[%c56, %c0_28], %154 {strides = array<i32>} : memref<64x32xf32, #tpu.memory_space<vmem>>, vector<8x32xf32>,
    %c0_29 = arith.constant 0 : index
    %c0_30 = arith.constant 0 : index
    %156 = vector.load %arg2[%c0_29, %c0_30] : memref<32x128xf32, #tpu.memory_space<vmem>>, vector<32x128xf32>
    %c0_31 = arith.constant 0 : index
    %c0_32 = arith.constant 0 : index
    %157 = vector.load %arg3[%c0_31, %c0_32] : memref<32x128xf32, #tpu.memory_space<vmem>>, vector<32x128xf32>
    %c0_33 = arith.constant 0 : index
    %c0_34 = arith.constant 0 : index
    %158 = vector.load %arg4[%c0_33, %c0_34] : memref<1x128xf32, #tpu.memory_space<vmem>>, vector<1x128xf32>
    %c0_35 = arith.constant 0 : index
    %c0_36 = arith.constant 0 : index
    %159 = vector.load %arg8[%c0_35, %c0_36] : memref<64x32xf32, #tpu.memory_space<vmem>>, vector<64x32xf32>
    %cst_37 = arith.constant dense<0.000000e+00> : vector<64x128xf32>
    %160 = tpu.matmul %159, %156, %cst_37 {dimension_numbers = #tpu.dot_dimension_numbers<[1], [0], [0], [1], [0, 0, 1, 1], [], []>} : vector<64x32xf32>, vector<32x128xf32>, vector<64x128xf32> -> vector<64x128xf32>
    %161 = vector.broadcast %158 : vector<1x128xf32> to vector<64x128xf32>
    %162 = arith.addf %160, %161 : vector<64x128xf32>
    %cst_38 = arith.constant 0.000000e+00 : f32
    %163 = vector.broadcast %cst_38 : f32 to vector<8x32xf32>
    %cst_39 = arith.constant 0.000000e+00 : f32
    %164 = vector.broadcast %cst_39 : f32 to vector<8x32xf32>
    %165 = vector.extract_strided_slice %162 {offsets = [0, 0], sizes = [8, 128], strides = [1, 1]} : vector<64x128xf32> to vector<8x128xf32>
    %cst_40 = arith.constant dense<0.000000e+00> : vector<8x128xf32>
    %166 = tpu.matmul %163, %157, %cst_40 {dimension_numbers = #tpu.dot_dimension_numbers<[1], [0], [0], [1], [0, 0, 1, 1], [], []>} : vector<8x32xf32>, vector<32x128xf32>, vector<8x128xf32> -> vector<8x128xf32>
    %167 = arith.addf %165, %166 : vector<8x128xf32>
    %168 = arith.negf %167 : vector<8x128xf32>
    %169 = math.exp %168 : vector<8x128xf32>
    %cst_41 = arith.constant 1.000000e+00 : f32
    %170 = vector.broadcast %cst_41 : f32 to vector<8x128xf32>
    %171 = arith.addf %170, %169 : vector<8x128xf32>
    %172 = arith.divf %170, %171 : vector<8x128xf32>
    %173 = math.tanh %167 : vector<8x128xf32>
    %174 = vector.extract_strided_slice %172 {offsets = [0, 0], sizes = [8, 32], strides = [1, 1]} : vector<8x128xf32> to vector<8x32xf32>
    %175 = vector.extract_strided_slice %172 {offsets = [0, 32], sizes = [8, 32], strides = [1, 1]} : vector<8x128xf32> to vector<8x32xf32>
    %176 = vector.extract_strided_slice %173 {offsets = [0, 64], sizes = [8, 32], strides = [1, 1]} : vector<8x128xf32> to vector<8x32xf32>
    %177 = vector.extract_strided_slice %172 {offsets = [0, 96], sizes = [8, 32], strides = [1, 1]} : vector<8x128xf32> to vector<8x32xf32>
    %178 = arith.mulf %175, %164 : vector<8x32xf32>
    %179 = arith.mulf %174, %176 : vector<8x32xf32>
    %180 = arith.addf %178, %179 : vector<8x32xf32>
    %181 = math.tanh %180 : vector<8x32xf32>
    %182 = arith.mulf %177, %181 : vector<8x32xf32>
    %183 = vector.extract_strided_slice %162 {offsets = [8, 0], sizes = [8, 128], strides = [1, 1]} : vector<64x128xf32> to vector<8x128xf32>
    %cst_42 = arith.constant dense<0.000000e+00> : vector<8x128xf32>
    %184 = tpu.matmul %182, %157, %cst_42 {dimension_numbers = #tpu.dot_dimension_numbers<[1], [0], [0], [1], [0, 0, 1, 1], [], []>} : vector<8x32xf32>, vector<32x128xf32>, vector<8x128xf32> -> vector<8x128xf32>
    %185 = arith.addf %183, %184 : vector<8x128xf32>
    %186 = arith.negf %185 : vector<8x128xf32>
    %187 = math.exp %186 : vector<8x128xf32>
    %cst_43 = arith.constant 1.000000e+00 : f32
    %188 = vector.broadcast %cst_43 : f32 to vector<8x128xf32>
    %189 = arith.addf %188, %187 : vector<8x128xf32>
    %190 = arith.divf %188, %189 : vector<8x128xf32>
    %191 = math.tanh %185 : vector<8x128xf32>
    %192 = vector.extract_strided_slice %190 {offsets = [0, 0], sizes = [8, 32], strides = [1, 1]} : vector<8x128xf32> to vector<8x32xf32>
    %193 = vector.extract_strided_slice %190 {offsets = [0, 32], sizes = [8, 32], strides = [1, 1]} : vector<8x128xf32> to vector<8x32xf32>
    %194 = vector.extract_strided_slice %191 {offsets = [0, 64], sizes = [8, 32], strides = [1, 1]} : vector<8x128xf32> to vector<8x32xf32>
    %195 = vector.extract_strided_slice %190 {offsets = [0, 96], sizes = [8, 32], strides = [1, 1]} : vector<8x128xf32> to vector<8x32xf32>
    %196 = arith.mulf %193, %180 : vector<8x32xf32>
    %197 = arith.mulf %192, %194 : vector<8x32xf32>
    %198 = arith.addf %196, %197 : vector<8x32xf32>
    %199 = math.tanh %198 : vector<8x32xf32>
    %200 = arith.mulf %195, %199 : vector<8x32xf32>
    %201 = vector.extract_strided_slice %162 {offsets = [16, 0], sizes = [8, 128], strides = [1, 1]} : vector<64x128xf32> to vector<8x128xf32>
    %cst_44 = arith.constant dense<0.000000e+00> : vector<8x128xf32>
    %202 = tpu.matmul %200, %157, %cst_44 {dimension_numbers = #tpu.dot_dimension_numbers<[1], [0], [0], [1], [0, 0, 1, 1], [], []>} : vector<8x32xf32>, vector<32x128xf32>, vector<8x128xf32> -> vector<8x128xf32>
    %203 = arith.addf %201, %202 : vector<8x128xf32>
    %204 = arith.negf %203 : vector<8x128xf32>
    %205 = math.exp %204 : vector<8x128xf32>
    %cst_45 = arith.constant 1.000000e+00 : f32
    %206 = vector.broadcast %cst_45 : f32 to vector<8x128xf32>
    %207 = arith.addf %206, %205 : vector<8x128xf32>
    %208 = arith.divf %206, %207 : vector<8x128xf32>
    %209 = math.tanh %203 : vector<8x128xf32>
    %210 = vector.extract_strided_slice %208 {offsets = [0, 0], sizes = [8, 32], strides = [1, 1]} : vector<8x128xf32> to vector<8x32xf32>
    %211 = vector.extract_strided_slice %208 {offsets = [0, 32], sizes = [8, 32], strides = [1, 1]} : vector<8x128xf32> to vector<8x32xf32>
    %212 = vector.extract_strided_slice %209 {offsets = [0, 64], sizes = [8, 32], strides = [1, 1]} : vector<8x128xf32> to vector<8x32xf32>
    %213 = vector.extract_strided_slice %208 {offsets = [0, 96], sizes = [8, 32], strides = [1, 1]} : vector<8x128xf32> to vector<8x32xf32>
    %214 = arith.mulf %211, %198 : vector<8x32xf32>
    %215 = arith.mulf %210, %212 : vector<8x32xf32>
    %216 = arith.addf %214, %215 : vector<8x32xf32>
    %217 = math.tanh %216 : vector<8x32xf32>
    %218 = arith.mulf %213, %217 : vector<8x32xf32>
    %219 = vector.extract_strided_slice %162 {offsets = [24, 0], sizes = [8, 128], strides = [1, 1]} : vector<64x128xf32> to vector<8x128xf32>
    %cst_46 = arith.constant dense<0.000000e+00> : vector<8x128xf32>
    %220 = tpu.matmul %218, %157, %cst_46 {dimension_numbers = #tpu.dot_dimension_numbers<[1], [0], [0], [1], [0, 0, 1, 1], [], []>} : vector<8x32xf32>, vector<32x128xf32>, vector<8x128xf32> -> vector<8x128xf32>
    %221 = arith.addf %219, %220 : vector<8x128xf32>
    %222 = arith.negf %221 : vector<8x128xf32>
    %223 = math.exp %222 : vector<8x128xf32>
    %cst_47 = arith.constant 1.000000e+00 : f32
    %224 = vector.broadcast %cst_47 : f32 to vector<8x128xf32>
    %225 = arith.addf %224, %223 : vector<8x128xf32>
    %226 = arith.divf %224, %225 : vector<8x128xf32>
    %227 = math.tanh %221 : vector<8x128xf32>
    %228 = vector.extract_strided_slice %226 {offsets = [0, 0], sizes = [8, 32], strides = [1, 1]} : vector<8x128xf32> to vector<8x32xf32>
    %229 = vector.extract_strided_slice %226 {offsets = [0, 32], sizes = [8, 32], strides = [1, 1]} : vector<8x128xf32> to vector<8x32xf32>
    %230 = vector.extract_strided_slice %227 {offsets = [0, 64], sizes = [8, 32], strides = [1, 1]} : vector<8x128xf32> to vector<8x32xf32>
    %231 = vector.extract_strided_slice %226 {offsets = [0, 96], sizes = [8, 32], strides = [1, 1]} : vector<8x128xf32> to vector<8x32xf32>
    %232 = arith.mulf %229, %216 : vector<8x32xf32>
    %233 = arith.mulf %228, %230 : vector<8x32xf32>
    %234 = arith.addf %232, %233 : vector<8x32xf32>
    %235 = math.tanh %234 : vector<8x32xf32>
    %236 = arith.mulf %231, %235 : vector<8x32xf32>
    %237 = vector.extract_strided_slice %162 {offsets = [32, 0], sizes = [8, 128], strides = [1, 1]} : vector<64x128xf32> to vector<8x128xf32>
    %cst_48 = arith.constant dense<0.000000e+00> : vector<8x128xf32>
    %238 = tpu.matmul %236, %157, %cst_48 {dimension_numbers = #tpu.dot_dimension_numbers<[1], [0], [0], [1], [0, 0, 1, 1], [], []>} : vector<8x32xf32>, vector<32x128xf32>, vector<8x128xf32> -> vector<8x128xf32>
    %239 = arith.addf %237, %238 : vector<8x128xf32>
    %240 = arith.negf %239 : vector<8x128xf32>
    %241 = math.exp %240 : vector<8x128xf32>
    %cst_49 = arith.constant 1.000000e+00 : f32
    %242 = vector.broadcast %cst_49 : f32 to vector<8x128xf32>
    %243 = arith.addf %242, %241 : vector<8x128xf32>
    %244 = arith.divf %242, %243 : vector<8x128xf32>
    %245 = math.tanh %239 : vector<8x128xf32>
    %246 = vector.extract_strided_slice %244 {offsets = [0, 0], sizes = [8, 32], strides = [1, 1]} : vector<8x128xf32> to vector<8x32xf32>
    %247 = vector.extract_strided_slice %244 {offsets = [0, 32], sizes = [8, 32], strides = [1, 1]} : vector<8x128xf32> to vector<8x32xf32>
    %248 = vector.extract_strided_slice %245 {offsets = [0, 64], sizes = [8, 32], strides = [1, 1]} : vector<8x128xf32> to vector<8x32xf32>
    %249 = vector.extract_strided_slice %244 {offsets = [0, 96], sizes = [8, 32], strides = [1, 1]} : vector<8x128xf32> to vector<8x32xf32>
    %250 = arith.mulf %247, %234 : vector<8x32xf32>
    %251 = arith.mulf %246, %248 : vector<8x32xf32>
    %252 = arith.addf %250, %251 : vector<8x32xf32>
    %253 = math.tanh %252 : vector<8x32xf32>
    %254 = arith.mulf %249, %253 : vector<8x32xf32>
    %255 = vector.extract_strided_slice %162 {offsets = [40, 0], sizes = [8, 128], strides = [1, 1]} : vector<64x128xf32> to vector<8x128xf32>
    %cst_50 = arith.constant dense<0.000000e+00> : vector<8x128xf32>
    %256 = tpu.matmul %254, %157, %cst_50 {dimension_numbers = #tpu.dot_dimension_numbers<[1], [0], [0], [1], [0, 0, 1, 1], [], []>} : vector<8x32xf32>, vector<32x128xf32>, vector<8x128xf32> -> vector<8x128xf32>
    %257 = arith.addf %255, %256 : vector<8x128xf32>
    %258 = arith.negf %257 : vector<8x128xf32>
    %259 = math.exp %258 : vector<8x128xf32>
    %cst_51 = arith.constant 1.000000e+00 : f32
    %260 = vector.broadcast %cst_51 : f32 to vector<8x128xf32>
    %261 = arith.addf %260, %259 : vector<8x128xf32>
    %262 = arith.divf %260, %261 : vector<8x128xf32>
    %263 = math.tanh %257 : vector<8x128xf32>
    %264 = vector.extract_strided_slice %262 {offsets = [0, 0], sizes = [8, 32], strides = [1, 1]} : vector<8x128xf32> to vector<8x32xf32>
    %265 = vector.extract_strided_slice %262 {offsets = [0, 32], sizes = [8, 32], strides = [1, 1]} : vector<8x128xf32> to vector<8x32xf32>
    %266 = vector.extract_strided_slice %263 {offsets = [0, 64], sizes = [8, 32], strides = [1, 1]} : vector<8x128xf32> to vector<8x32xf32>
    %267 = vector.extract_strided_slice %262 {offsets = [0, 96], sizes = [8, 32], strides = [1, 1]} : vector<8x128xf32> to vector<8x32xf32>
    %268 = arith.mulf %265, %252 : vector<8x32xf32>
    %269 = arith.mulf %264, %266 : vector<8x32xf32>
    %270 = arith.addf %268, %269 : vector<8x32xf32>
    %271 = math.tanh %270 : vector<8x32xf32>
    %272 = arith.mulf %267, %271 : vector<8x32xf32>
    %273 = vector.extract_strided_slice %162 {offsets = [48, 0], sizes = [8, 128], strides = [1, 1]} : vector<64x128xf32> to vector<8x128xf32>
    %cst_52 = arith.constant dense<0.000000e+00> : vector<8x128xf32>
    %274 = tpu.matmul %272, %157, %cst_52 {dimension_numbers = #tpu.dot_dimension_numbers<[1], [0], [0], [1], [0, 0, 1, 1], [], []>} : vector<8x32xf32>, vector<32x128xf32>, vector<8x128xf32> -> vector<8x128xf32>
    %275 = arith.addf %273, %274 : vector<8x128xf32>
    %276 = arith.negf %275 : vector<8x128xf32>
    %277 = math.exp %276 : vector<8x128xf32>
    %cst_53 = arith.constant 1.000000e+00 : f32
    %278 = vector.broadcast %cst_53 : f32 to vector<8x128xf32>
    %279 = arith.addf %278, %277 : vector<8x128xf32>
    %280 = arith.divf %278, %279 : vector<8x128xf32>
    %281 = math.tanh %275 : vector<8x128xf32>
    %282 = vector.extract_strided_slice %280 {offsets = [0, 0], sizes = [8, 32], strides = [1, 1]} : vector<8x128xf32> to vector<8x32xf32>
    %283 = vector.extract_strided_slice %280 {offsets = [0, 32], sizes = [8, 32], strides = [1, 1]} : vector<8x128xf32> to vector<8x32xf32>
    %284 = vector.extract_strided_slice %281 {offsets = [0, 64], sizes = [8, 32], strides = [1, 1]} : vector<8x128xf32> to vector<8x32xf32>
    %285 = vector.extract_strided_slice %280 {offsets = [0, 96], sizes = [8, 32], strides = [1, 1]} : vector<8x128xf32> to vector<8x32xf32>
    %286 = arith.mulf %283, %270 : vector<8x32xf32>
    %287 = arith.mulf %282, %284 : vector<8x32xf32>
    %288 = arith.addf %286, %287 : vector<8x32xf32>
    %289 = math.tanh %288 : vector<8x32xf32>
    %290 = arith.mulf %285, %289 : vector<8x32xf32>
    %291 = vector.extract_strided_slice %162 {offsets = [56, 0], sizes = [8, 128], strides = [1, 1]} : vector<64x128xf32> to vector<8x128xf32>
    %cst_54 = arith.constant dense<0.000000e+00> : vector<8x128xf32>
    %292 = tpu.matmul %290, %157, %cst_54 {dimension_numbers = #tpu.dot_dimension_numbers<[1], [0], [0], [1], [0, 0, 1, 1], [], []>} : vector<8x32xf32>, vector<32x128xf32>, vector<8x128xf32> -> vector<8x128xf32>
    %293 = arith.addf %291, %292 : vector<8x128xf32>
    %294 = arith.negf %293 : vector<8x128xf32>
    %295 = math.exp %294 : vector<8x128xf32>
    %cst_55 = arith.constant 1.000000e+00 : f32
    %296 = vector.broadcast %cst_55 : f32 to vector<8x128xf32>
    %297 = arith.addf %296, %295 : vector<8x128xf32>
    %298 = arith.divf %296, %297 : vector<8x128xf32>
    %299 = math.tanh %293 : vector<8x128xf32>
    %300 = vector.extract_strided_slice %298 {offsets = [0, 0], sizes = [8, 32], strides = [1, 1]} : vector<8x128xf32> to vector<8x32xf32>
    %301 = vector.extract_strided_slice %298 {offsets = [0, 32], sizes = [8, 32], strides = [1, 1]} : vector<8x128xf32> to vector<8x32xf32>
    %302 = vector.extract_strided_slice %299 {offsets = [0, 64], sizes = [8, 32], strides = [1, 1]} : vector<8x128xf32> to vector<8x32xf32>
    %303 = vector.extract_strided_slice %298 {offsets = [0, 96], sizes = [8, 32], strides = [1, 1]} : vector<8x128xf32> to vector<8x32xf32>
    %304 = arith.mulf %301, %288 : vector<8x32xf32>
    %305 = arith.mulf %300, %302 : vector<8x32xf32>
    %306 = arith.addf %304, %305 : vector<8x32xf32>
    %307 = math.tanh %306 : vector<8x32xf32>
    %308 = arith.mulf %303, %307 : vector<8x32xf32>
    %c0_56 = arith.constant 0 : index
    %c0_57 = arith.constant 0 : index
    %309 = vector.load %arg5[%c0_56, %c0_57] : memref<32x4xf32, #tpu.memory_space<vmem>>, vector<32x4xf32>
    %cst_58 = arith.constant dense<0.000000e+00> : vector<8x4xf32>
    %310 = tpu.matmul %308, %309, %cst_58 {dimension_numbers = #tpu.dot_dimension_numbers<[1], [0], [0], [1], [0, 0, 1, 1], [], []>} : vector<8x32xf32>, vector<32x4xf32>, vector<8x4xf32> -> vector<8x4xf32>
    %c0_59 = arith.constant 0 : index
    %c0_60 = arith.constant 0 : index
    %311 = vector.load %arg6[%c0_59, %c0_60] : memref<1x4xf32, #tpu.memory_space<vmem>>, vector<1x4xf32>
    %312 = vector.broadcast %311 : vector<1x4xf32> to vector<8x4xf32>
    %313 = arith.addf %310, %312 : vector<8x4xf32>
    %c0_61 = arith.constant 0 : index
    %c0_62 = arith.constant 0 : index
    %314 = vector.load %arg7[%c0_61, %c0_62] : memref<8x4xf32, #tpu.memory_space<vmem>>, vector<8x4xf32>
    tpu.vector_store %arg7[%c0_61, %c0_62], %313 {strides = array<i32>} : memref<8x4xf32, #tpu.memory_space<vmem>>, vector<8x4xf32>,
    return
  }
}

</mosaic_0001>

<bundles_post_ra>
// kernel: tpu_custom_call.1
= control target key start
LH: loop header
LB: loop body
LE: loop exit
PB: predicated region body
PF: predicated region fallthrough
CT: control target
= control target key end

     0   :  { %12 = vsyncpa [#allocation4], 0  ;;  %s1775_s0 = inlined_call_operand.hbm [shape: f32[64,128], index: 0, kind: input, shape index: {}]   ;;  %s1776_s1 = inlined_call_operand.vmem [shape: f32[32,128], index: 1, kind: input, shape index: {}]   ;;  %s1777_s2 = inlined_call_operand.hbm [shape: f32[32,128], index: 2, kind: input, shape index: {}]   ;;  %s1778_s3 = inlined_call_operand.hbm [shape: f32[32,128], index: 3, kind: input, shape index: {}]   ;;  %s1779_s4 = inlined_call_operand.vmem [shape: f32[1,128], index: 4, kind: input, shape index: {}]   ;;  %s1780_s5 = inlined_call_operand.vmem [shape: f32[32,4], index: 5, kind: input, shape index: {}]   ;;  %s1781_s6 = inlined_call_operand.vmem [shape: f32[1,4], index: 6, kind: input, shape index: {}]   ;;  %s1782_s7 = inlined_call_operand.vmem [shape: f32[8,4], index: 7, kind: output, shape index: {}]  }
   0x1   :  { %13 = vsyncpa [#allocation6], 0  ;;  %s33_s26 = sshll.u32 %s1777_s2, 4  ;;  %s1489_s27 = smov [#allocation5]   ;;  %s34_s26 = int_to_ptr.hbm [resolvable:$true] %s33_s26 }
   0x2   :  { %s35_s28 = sshll.u32 %s1489_s27, 4  ;;  %s18_s8 = sshll.u32 %s1775_s0, 4  ;;  %s36_s28 = int_to_ptr.vmem [resolvable:$true] %s35_s28  ;;  %s19_s8 = int_to_ptr.hbm [resolvable:$true] %s18_s8 }
   0x3   :  { %s1490_s9 = smov 128   ;;  %s1491_s10 = smov 8  }
   0x4   :  { %41 = dma.hbm_to_vmem [thread:$0]  %s34_s26, 512, %s36_s28, [#allocation6], %s1490_s9, %s1490_s9, %s1491_s10  }
   0x5   :  { %s1492_s11 = smov [#allocation3]   ;;  %s46_s15 = sshll.u32 %s1778_s3, 4  ;;  %s47_s15 = int_to_ptr.hbm [resolvable:$true] %s46_s15 }
   0x6   :  { %s20_s12 = sshll.u32 %s1492_s11, 4  ;;  %s1493_s2 = smov [#allocation7]   ;;  %s21_s12 = int_to_ptr.vmem [resolvable:$true] %s20_s12 }
   0x7   :  { %26 = dma.hbm_to_vmem [thread:$0]  %s19_s8, 1024, %s21_s12, [#allocation4], %s1490_s9, %s1490_s9, %s1491_s10  }
   0x8   :  { %s48_s16 = sshll.u32 %s1493_s2, 4  ;;  %s49_s16 = int_to_ptr.vmem [resolvable:$true] %s48_s16 }
   0x9   :  { %54 = dma.hbm_to_vmem [thread:$0]  %s47_s15, 512, %s49_s16, [#allocation6], %s1490_s9, %s1490_s9, %s1491_s10  }
   0xa   :  { %1485 = dma.done.wait [#allocation4], 1024  }
   0xb   :  { %1486 = vsyncadd [#allocation4], 4294966272 }
   0xc   :  { %1487 = dma.done.wait [#allocation6], 1024  }
   0xd   :  { %1488 = vsyncadd [#allocation6], 4294966272  ;;  %v1549_v0 = vld [vmem:[%s1776_s1 + $0x18] sm:$0xff]  ;;  %v1554_v1 = vld [vmem:[%s1776_s1 + $0x10] sm:$0xff]  ;;  %v1494_v4 = vmov 0.0   ;;  %s1496_s23 = smov 32  }
   0xe   :  { %101 = vmatpush.msra.mxu3 %v1549_v0  ;;  %166 = vmatpush.msra.mxu2 %v1549_v0  ;;  %v1561_v2 = vld [vmem:[%s1776_s1 + $0x8] sm:$0xff]  ;;  %v1570_v3 = vld [vmem:[%s1776_s1] sm:$0xff]  ;;  %s1495_s1 = smov 64   ;;  %vm85_vm4 = vcmask 261120   ;;  %v75_v57 = vld [vmem:[#allocation3 + $0x10] sm:$0xff] }
   0xf   :  { %361 = vmatpush.msra.mxu0 %v1549_v0  ;;  %426 = vmatpush.msra.mxu1 %v1549_v0  ;;  %v73_v5 = vld [vmem:[#allocation3] sm:$0xff]  ;;  %v74_v31 = vld [vmem:[#allocation3 + $0x8] sm:$0xff] }
  0x10   :  { %102 = vmatpush.msra.mxu3 %v1554_v1  ;;  %167 = vmatpush.msra.mxu2 %v1554_v1 }
  0x11   :  { %362 = vmatpush.msra.mxu0 %v1554_v1  ;;  %427 = vmatpush.msra.mxu1 %v1554_v1 }
  0x12   :  { %103 = vmatpush.msra.mxu3 %v1561_v2  ;;  %168 = vmatpush.msra.mxu2 %v1561_v2 }
  0x13   :  { %363 = vmatpush.msra.mxu0 %v1561_v2  ;;  %428 = vmatpush.msra.mxu1 %v1561_v2 }
  0x14   :  { %104 = vmatpush.msra.mxu3 %v1570_v3  ;;  %169 = vmatpush.msra.mxu2 %v1570_v3 }
  0x15   :  { %105 = vmatmul.f32.vlgmr.msra.gmra.mxu3 %v1494_v4  ;;  %364 = vmatpush.msra.mxu0 %v1570_v3 }
  0x16   :  { %231 = vmatpush.msrb.mxu2 %v1549_v0  ;;  %296 = vmatpush.msrb.mxu3 %v1549_v0 }
  0x17   :  { %429 = vmatpush.msra.mxu1 %v1570_v3 }
  0x18   :  { %232 = vmatpush.msrb.mxu2 %v1554_v1  ;;  %297 = vmatpush.msrb.mxu3 %v1554_v1 }
  0x1a   :  { %233 = vmatpush.msrb.mxu2 %v1561_v2  ;;  %298 = vmatpush.msrb.mxu3 %v1561_v2 }
  0x1c   :  { %234 = vmatpush.msrb.mxu2 %v1570_v3  ;;  %299 = vmatpush.msrb.mxu3 %v1570_v3 }
  0x1e   :  { %556 = vmatpush.msra.mxu3 %v1549_v0 }
  0x20   :  { %557 = vmatpush.msra.mxu3 %v1554_v1 }
  0x22   :  { %558 = vmatpush.msra.mxu3 %v1561_v2 }
  0x24   :  { %559 = vmatpush.msra.mxu3 %v1570_v3 }
  0x98   :  { %v106_v6 = vpop.f32.mrf.mxu3 }
  0x99   :  { %v109_v7 = vadd.f32 %v106_v6, %v73_v5 }
  0x9b   :  { %1285 = vtanh.f32 %v109_v7  ;;  %v1232_v9 = vmul.f32 -1.442695, %v109_v7 }
  0x9d   :  { %1287 = vpow2.f32 %v1232_v9 }
  0xa1   :  { %v1286_v8 = vpop.eup %1285 }
  0xa2   :  { %132 = vrot.lane.b32.xlu0 %v1286_v8, %s1495_s1 }
  0xa3   :  { %v1288_v10 = vpop.eup %1287 }
  0xa4   :  { %v113_v11 = vadd.f32 1.0, %v1288_v10 }
  0xa6   :  { %1289 = vrcp.f32 %v113_v11  ;;  %v125_v17 = vand.u32 2147483648, %v113_v11  ;;  %vm119_vm1 = vweird.f32 %v113_v11  ;;  %v123_v18 = vand.u32 2147483647, %v113_v11 }
  0xa8   :  { %v126_v20 = vor.u32 1.1754944e-38, %v125_v17  ;;  %vm124_vm3 = vcmp.eq.f32.partialorder %v123_v18, 8.507059e+37 }
  0xac   :  { %v1290_v12 = vpop.eup %1289 }
  0xad   :  { %v115_v13 = vmul.f32 %v1290_v12, %v113_v11  ;;  %vm120_vm0 = vweird.f32 %v1290_v12 }
  0xae   :  { %vm121_vm2 = vmor %vm119_vm1, %vm120_vm0 }
  0xaf   :  { %v116_v14 = vsub.f32 1.0, %v115_v13 }
  0xb1   :  { %v117_v15 = vmul.f32 %v1290_v12, %v116_v14 }
  0xb3   :  { %v118_v16 = vadd.f32 %v1290_v12, %v117_v15 }
  0xb5   :  { %v122_v19 = vsel %vm121_vm2, %v1290_v12, %v118_v16 }
  0xb6   :  { %v127_v22 = vsel %vm124_vm3, %v126_v20, %v122_v19  ;;  %v76_v20 = vld [vmem:[#allocation3 + $0x18] sm:$0xff] }
  0xb7   :  { %v130_v24 = vmul.f32 0.0, %v127_v22 }
 0x114   :  { %v133_v21 = vpop.permute.xlu0 %132 }
 0x115   :  { %v135_v23 = vmul.f32 %v133_v21, %v127_v22 }
 0x117   :  { %137 = vrot.lane.b32.xlu0 %v135_v23, %s1496_s23 }
 0x189   :  { %v138_v25 = vpop.permute.xlu0 %137 }
 0x18a   :  { %v140_v26 = vadd.f32 %v138_v25, %v130_v24 }
 0x18c   :  { %1291 = vtanh.f32 %v140_v26 }
 0x192   :  { %v1292_v27 = vpop.eup %1291 }
 0x193   :  { %143 = vrot.lane.b32.xlu1 %v1292_v27, %s1495_s1 }
 0x205   :  { %v144_v28 = vpop.permute.xlu1 %143 }
 0x206   :  { %v146_v29 = vmul.f32 %v144_v28, %v127_v22 }
 0x208   :  { %148 = vrot.lane.b32.xlu1 %v146_v29, %s1496_s23 }
 0x27a   :  { %v149_v30 = vpop.permute.xlu1 %148 }
 0x27b   :  { %151 = vst.msk [vmem:[#allocation2] sm:$0xff] %vm85_vm4, %v149_v30  ;;  %1233 = vmatmul.msk.f32.vlgmr.msra.gmra.mxu2 %vm85_vm4, %v149_v30 }
 0x27c   :  { %491 = vmatpush.msra.mxu2 %v1549_v0 }
 0x27e   :  { %492 = vmatpush.msra.mxu2 %v1554_v1 }
 0x280   :  { %493 = vmatpush.msra.mxu2 %v1561_v2 }
 0x282   :  { %494 = vmatpush.msra.mxu2 %v1570_v3 }
 0x2fe   :  { %v171_v32 = vpop.f32.mrf.mxu2 }
 0x2ff   :  { %v174_v33 = vadd.f32 %v171_v32, %v74_v31 }
 0x301   :  { %1293 = vtanh.f32 %v174_v33  ;;  %v1234_v35 = vmul.f32 -1.442695, %v174_v33 }
 0x303   :  { %1295 = vpow2.f32 %v1234_v35 }
 0x307   :  { %v1294_v34 = vpop.eup %1293 }
 0x308   :  { %197 = vrot.lane.b32.xlu2 %v1294_v34, %s1495_s1 }
 0x309   :  { %v1296_v36 = vpop.eup %1295 }
 0x30a   :  { %v178_v37 = vadd.f32 1.0, %v1296_v36 }
 0x30c   :  { %1297 = vrcp.f32 %v178_v37  ;;  %v190_v43 = vand.u32 2147483648, %v178_v37  ;;  %vm184_vm6 = vweird.f32 %v178_v37  ;;  %v188_v44 = vand.u32 2147483647, %v178_v37 }
 0x30e   :  { %v191_v46 = vor.u32 1.1754944e-38, %v190_v43  ;;  %vm189_vm8 = vcmp.eq.f32.partialorder %v188_v44, 8.507059e+37 }
 0x312   :  { %v1298_v38 = vpop.eup %1297 }
 0x313   :  { %v180_v39 = vmul.f32 %v1298_v38, %v178_v37  ;;  %vm185_vm5 = vweird.f32 %v1298_v38 }
 0x314   :  { %vm186_vm7 = vmor %vm184_vm6, %vm185_vm5 }
 0x315   :  { %v181_v40 = vsub.f32 1.0, %v180_v39 }
 0x317   :  { %v182_v41 = vmul.f32 %v1298_v38, %v181_v40 }
 0x319   :  { %v183_v42 = vadd.f32 %v1298_v38, %v182_v41 }
 0x31b   :  { %v187_v45 = vsel %vm186_vm7, %v1298_v38, %v183_v42 }
 0x31c   :  { %v192_v48 = vsel %vm189_vm8, %v191_v46, %v187_v45  ;;  %v610_v45 = vld [vmem:[#allocation5 + $0x18] sm:$0xff]  ;;  %v609_v46 = vld [vmem:[#allocation5 + $0x10] sm:$0xff] }
 0x31d   :  { %v195_v50 = vmul.f32 %v192_v48, %v140_v26  ;;  %663 = vmatpush.msrb.mxu0 %v610_v45  ;;  %1271 = vmatpush.msrb.mxu1 %v610_v45  ;;  %v79_v45 = vld [vmem:[#allocation3 + $0x30] sm:$0xff] }
 0x31f   :  { %664 = vmatpush.msrb.mxu0 %v609_v46  ;;  %1272 = vmatpush.msrb.mxu1 %v609_v46 }
 0x362   :  { %v198_v47 = vpop.permute.xlu2 %197 }
 0x363   :  { %v200_v49 = vmul.f32 %v198_v47, %v192_v48  ;;  %v608_v47 = vld [vmem:[#allocation5 + $0x8] sm:$0xff] }
 0x364   :  { %665 = vmatpush.msrb.mxu0 %v608_v47  ;;  %1273 = vmatpush.msrb.mxu1 %v608_v47 }
 0x365   :  { %202 = vrot.lane.b32.xlu2 %v200_v49, %s1496_s23 }
 0x3bf   :  { %v203_v51 = vpop.permute.xlu2 %202 }
 0x3c0   :  { %v205_v52 = vadd.f32 %v203_v51, %v195_v50  ;;  %v616_v50 = vld [vmem:[#allocation2] sm:$0xff] }
 0x3c2   :  { %1299 = vtanh.f32 %v205_v52 }
 0x3c8   :  { %v1300_v53 = vpop.eup %1299 }
 0x3c9   :  { %208 = vrot.lane.b32.xlu0 %v1300_v53, %s1495_s1 }
 0x43b   :  { %v209_v54 = vpop.permute.xlu0 %208 }
 0x43c   :  { %v211_v55 = vmul.f32 %v209_v54, %v192_v48  ;;  %v607_v48 = vld [vmem:[#allocation5] sm:$0xff] }
 0x43d   :  { %666 = vmatpush.msrb.mxu0 %v607_v48  ;;  %1274 = vmatpush.msrb.mxu1 %v607_v48  ;;  %v77_v54 = vld [vmem:[#allocation3 + $0x20] sm:$0xff] }
 0x43e   :  { %213 = vrot.lane.b32.xlu1 %v211_v55, %s1496_s23 }
 0x4b0   :  { %v214_v56 = vpop.permute.xlu1 %213 }
 0x4b1   :  { %216 = vst.msk [vmem:[#allocation2 + $0x8] sm:$0xff] %vm85_vm4, %v214_v56  ;;  %1235 = vmatmul.msk.f32.vlgmr.msrb.gmra.mxu2 %vm85_vm4, %v214_v56 }
 0x4b8   :  { %v617_v51 = vld [vmem:[#allocation2 + $0x8] sm:$0xff] }
 0x534   :  { %v236_v58 = vpop.f32.mrf.mxu2 }
 0x535   :  { %v239_v59 = vadd.f32 %v236_v58, %v75_v57 }
 0x537   :  { %1301 = vtanh.f32 %v239_v59  ;;  %v1236_v61 = vmul.f32 -1.442695, %v239_v59 }
 0x539   :  { %1303 = vpow2.f32 %v1236_v61 }
 0x53d   :  { %v1302_v60 = vpop.eup %1301 }
 0x53e   :  { %262 = vrot.lane.b32.xlu2 %v1302_v60, %s1495_s1 }
 0x53f   :  { %v1304_v62 = vpop.eup %1303 }
 0x540   :  { %v243_v63 = vadd.f32 1.0, %v1304_v62 }
 0x542   :  { %1305 = vrcp.f32 %v243_v63  ;;  %v255_v6 = vand.u32 2147483648, %v243_v63  ;;  %vm249_vm10 = vweird.f32 %v243_v63  ;;  %v253_v7 = vand.u32 2147483647, %v243_v63 }
 0x544   :  { %v256_v9 = vor.u32 1.1754944e-38, %v255_v6  ;;  %vm254_vm12 = vcmp.eq.f32.partialorder %v253_v7, 8.507059e+37 }
 0x548   :  { %v1306_v0 = vpop.eup %1305 }
 0x549   :  { %v245_v1 = vmul.f32 %v1306_v0, %v243_v63  ;;  %vm250_vm9 = vweird.f32 %v1306_v0 }
 0x54a   :  { %vm251_vm11 = vmor %vm249_vm10, %vm250_vm9 }
 0x54b   :  { %v246_v2 = vsub.f32 1.0, %v245_v1 }
 0x54d   :  { %v247_v3 = vmul.f32 %v1306_v0, %v246_v2 }
 0x54f   :  { %v248_v5 = vadd.f32 %v1306_v0, %v247_v3 }
 0x551   :  { %v252_v8 = vsel %vm251_vm11, %v1306_v0, %v248_v5 }
 0x552   :  { %v257_v11 = vsel %vm254_vm12, %v256_v9, %v252_v8 }
 0x553   :  { %v260_v13 = vmul.f32 %v257_v11, %v205_v52 }
 0x598   :  { %v263_v10 = vpop.permute.xlu2 %262 }
 0x599   :  { %v265_v12 = vmul.f32 %v263_v10, %v257_v11 }
 0x59b   :  { %267 = vrot.lane.b32.xlu0 %v265_v12, %s1496_s23 }
 0x60d   :  { %v268_v14 = vpop.permute.xlu0 %267 }
 0x60e   :  { %v270_v15 = vadd.f32 %v268_v14, %v260_v13 }
 0x610   :  { %1307 = vtanh.f32 %v270_v15 }
 0x616   :  { %v1308_v16 = vpop.eup %1307 }
 0x617   :  { %273 = vrot.lane.b32.xlu1 %v1308_v16, %s1495_s1 }
 0x689   :  { %v274_v17 = vpop.permute.xlu1 %273 }
 0x68a   :  { %v276_v18 = vmul.f32 %v274_v17, %v257_v11 }
 0x68c   :  { %278 = vrot.lane.b32.xlu2 %v276_v18, %s1496_s23  ;;  %v78_v18 = vld [vmem:[#allocation3 + $0x28] sm:$0xff] }
 0x6e6   :  { %v279_v19 = vpop.permute.xlu2 %278 }
 0x6e7   :  { %281 = vst.msk [vmem:[#allocation2 + $0x10] sm:$0xff] %vm85_vm4, %v279_v19  ;;  %1237 = vmatmul.msk.f32.vlgmr.msrb.gmra.mxu3 %vm85_vm4, %v279_v19 }
 0x6ee   :  { %v618_v52 = vld [vmem:[#allocation2 + $0x10] sm:$0xff] }
 0x76a   :  { %v301_v21 = vpop.f32.mrf.mxu3 }
 0x76b   :  { %v304_v22 = vadd.f32 %v301_v21, %v76_v20 }
 0x76d   :  { %1309 = vtanh.f32 %v304_v22  ;;  %v1238_v24 = vmul.f32 -1.442695, %v304_v22 }
 0x76f   :  { %1311 = vpow2.f32 %v1238_v24 }
 0x773   :  { %v1310_v23 = vpop.eup %1309 }
 0x774   :  { %327 = vrot.lane.b32.xlu0 %v1310_v23, %s1495_s1 }
 0x775   :  { %v1312_v25 = vpop.eup %1311 }
 0x776   :  { %v308_v26 = vadd.f32 1.0, %v1312_v25 }
 0x778   :  { %1313 = vrcp.f32 %v308_v26  ;;  %v320_v32 = vand.u32 2147483648, %v308_v26  ;;  %vm314_vm14 = vweird.f32 %v308_v26  ;;  %v318_v33 = vand.u32 2147483647, %v308_v26 }
 0x77a   :  { %v321_v35 = vor.u32 1.1754944e-38, %v320_v32  ;;  %vm319_vm0 = vcmp.eq.f32.partialorder %v318_v33, 8.507059e+37 }
 0x77e   :  { %v1314_v27 = vpop.eup %1313 }
 0x77f   :  { %v310_v28 = vmul.f32 %v1314_v27, %v308_v26  ;;  %vm315_vm13 = vweird.f32 %v1314_v27 }
 0x780   :  { %vm316_vm15 = vmor %vm314_vm14, %vm315_vm13 }
 0x781   :  { %v311_v29 = vsub.f32 1.0, %v310_v28 }
 0x783   :  { %v312_v30 = vmul.f32 %v1314_v27, %v311_v29 }
 0x785   :  { %v313_v31 = vadd.f32 %v1314_v27, %v312_v30 }
 0x787   :  { %v317_v34 = vsel %vm316_vm15, %v1314_v27, %v313_v31 }
 0x788   :  { %v322_v37 = vsel %vm319_vm0, %v321_v35, %v317_v34 }
 0x789   :  { %v325_v39 = vmul.f32 %v322_v37, %v270_v15 }
 0x7e6   :  { %v328_v36 = vpop.permute.xlu0 %327 }
 0x7e7   :  { %v330_v38 = vmul.f32 %v328_v36, %v322_v37 }
 0x7e9   :  { %332 = vrot.lane.b32.xlu1 %v330_v38, %s1496_s23 }
 0x85b   :  { %v333_v40 = vpop.permute.xlu1 %332 }
 0x85c   :  { %v335_v41 = vadd.f32 %v333_v40, %v325_v39 }
 0x85e   :  { %1315 = vtanh.f32 %v335_v41 }
 0x864   :  { %v1316_v42 = vpop.eup %1315 }
 0x865   :  { %338 = vrot.lane.b32.xlu2 %v1316_v42, %s1495_s1 }
 0x8bf   :  { %v339_v43 = vpop.permute.xlu2 %338 }
 0x8c0   :  { %v341_v44 = vmul.f32 %v339_v43, %v322_v37 }
 0x8c2   :  { %343 = vrot.lane.b32.xlu0 %v341_v44, %s1496_s23 }
 0x934   :  { %v344_v49 = vpop.permute.xlu0 %343 }
 0x935   :  { %346 = vst.msk [vmem:[#allocation2 + $0x18] sm:$0xff] %vm85_vm4, %v344_v49  ;;  %1239 = vmatmul.msk.f32.vlgmr.msra.gmra.mxu0 %vm85_vm4, %v344_v49 }
 0x93c   :  { %v619_v53 = vld [vmem:[#allocation2 + $0x18] sm:$0xff] }
 0x93d   :  { %1247 = vmatmul.msk.f32.vlgmr.msrb.gmra.mxu0 %vm85_vm4, %v616_v50 }
 0x945   :  { %1248 = vmatmul.msk.f32.gmra.mxu0 %vm85_vm4, %v617_v51 }
 0x94d   :  { %1249 = vmatmul.msk.f32.gmra.mxu0 %vm85_vm4, %v618_v52 }
 0x955   :  { %1250 = vmatmul.msk.f32.gmra.mxu0 %vm85_vm4, %v619_v53 }
 0x9b2   :  { %v366_v55 = vpop.f32.mrf.mxu0 }
 0x9b3   :  { %v369_v56 = vadd.f32 %v366_v55, %v77_v54 }
 0x9b5   :  { %1317 = vtanh.f32 %v369_v56  ;;  %v1240_v58 = vmul.f32 -1.442695, %v369_v56 }
 0x9b7   :  { %1319 = vpow2.f32 %v1240_v58 }
 0x9bb   :  { %v1318_v57 = vpop.eup %1317 }
 0x9bc   :  { %392 = vrot.lane.b32.xlu1 %v1318_v57, %s1495_s1 }
 0x9bd   :  { %v1320_v59 = vpop.eup %1319 }
 0x9be   :  { %v373_v60 = vadd.f32 1.0, %v1320_v59 }
 0x9c0   :  { %1321 = vrcp.f32 %v373_v60  ;;  %v385_v2 = vand.u32 2147483648, %v373_v60  ;;  %vm379_vm2 = vweird.f32 %v373_v60  ;;  %v383_v3 = vand.u32 2147483647, %v373_v60 }
 0x9c2   :  { %v386_v6 = vor.u32 1.1754944e-38, %v385_v2  ;;  %vm384_vm5 = vcmp.eq.f32.partialorder %v383_v3, 8.507059e+37 }
 0x9c6   :  { %v1322_v61 = vpop.eup %1321 }
 0x9c7   :  { %v375_v62 = vmul.f32 %v1322_v61, %v373_v60  ;;  %vm380_vm1 = vweird.f32 %v1322_v61 }
 0x9c8   :  { %vm381_vm3 = vmor %vm379_vm2, %vm380_vm1 }
 0x9c9   :  { %v376_v63 = vsub.f32 1.0, %v375_v62 }
 0x9cb   :  { %v377_v0 = vmul.f32 %v1322_v61, %v376_v63 }
 0x9cd   :  { %v378_v1 = vadd.f32 %v1322_v61, %v377_v0 }
 0x9cf   :  { %v382_v5 = vsel %vm381_vm3, %v1322_v61, %v378_v1 }
 0x9d0   :  { %v387_v8 = vsel %vm384_vm5, %v386_v6, %v382_v5 }
 0x9d1   :  { %v390_v10 = vmul.f32 %v387_v8, %v335_v41 }
 0xa2e   :  { %v393_v7 = vpop.permute.xlu1 %392 }
 0xa2f   :  { %v395_v9 = vmul.f32 %v393_v7, %v387_v8 }
 0xa31   :  { %397 = vrot.lane.b32.xlu2 %v395_v9, %s1496_s23  ;;  %v80_v9 = vld [vmem:[#allocation3 + $0x38] sm:$0xff] }
 0xa8b   :  { %v398_v11 = vpop.permute.xlu2 %397 }
 0xa8c   :  { %v400_v12 = vadd.f32 %v398_v11, %v390_v10 }
 0xa8e   :  { %1323 = vtanh.f32 %v400_v12 }
 0xa94   :  { %v1324_v13 = vpop.eup %1323 }
 0xa95   :  { %403 = vrot.lane.b32.xlu0 %v1324_v13, %s1495_s1 }
 0xb07   :  { %v404_v14 = vpop.permute.xlu0 %403 }
 0xb08   :  { %v406_v15 = vmul.f32 %v404_v14, %v387_v8 }
 0xb0a   :  { %408 = vrot.lane.b32.xlu1 %v406_v15, %s1496_s23 }
 0xb7c   :  { %v409_v16 = vpop.permute.xlu1 %408 }
 0xb7d   :  { %411 = vst.msk [vmem:[#allocation2 + $0x20] sm:$0xff] %vm85_vm4, %v409_v16  ;;  %1241 = vmatmul.msk.f32.vlgmr.msra.gmra.mxu1 %vm85_vm4, %v409_v16 }
 0xb84   :  { %v620_v17 = vld [vmem:[#allocation2 + $0x20] sm:$0xff] }
 0xb85   :  { %1251 = vmatmul.msk.f32.gmra.mxu0 %vm85_vm4, %v620_v17 }
 0xbfa   :  { %v431_v19 = vpop.f32.mrf.mxu1 }
 0xbfb   :  { %v434_v20 = vadd.f32 %v431_v19, %v78_v18 }
 0xbfd   :  { %1325 = vtanh.f32 %v434_v20  ;;  %v1242_v22 = vmul.f32 -1.442695, %v434_v20 }
 0xbff   :  { %1327 = vpow2.f32 %v1242_v22 }
 0xc03   :  { %v1326_v21 = vpop.eup %1325 }
 0xc04   :  { %457 = vrot.lane.b32.xlu2 %v1326_v21, %s1495_s1 }
 0xc05   :  { %v1328_v23 = vpop.eup %1327 }
 0xc06   :  { %v438_v24 = vadd.f32 1.0, %v1328_v23 }
 0xc08   :  { %1329 = vrcp.f32 %v438_v24  ;;  %v450_v30 = vand.u32 2147483648, %v438_v24  ;;  %vm444_vm7 = vweird.f32 %v438_v24  ;;  %v448_v31 = vand.u32 2147483647, %v438_v24 }
 0xc0a   :  { %v451_v33 = vor.u32 1.1754944e-38, %v450_v30  ;;  %vm449_vm9 = vcmp.eq.f32.partialorder %v448_v31, 8.507059e+37 }
 0xc0e   :  { %v1330_v25 = vpop.eup %1329 }
 0xc0f   :  { %v440_v26 = vmul.f32 %v1330_v25, %v438_v24  ;;  %vm445_vm6 = vweird.f32 %v1330_v25 }
 0xc10   :  { %vm446_vm8 = vmor %vm444_vm7, %vm445_vm6 }
 0xc11   :  { %v441_v27 = vsub.f32 1.0, %v440_v26 }
 0xc13   :  { %v442_v28 = vmul.f32 %v1330_v25, %v441_v27 }
 0xc15   :  { %v443_v29 = vadd.f32 %v1330_v25, %v442_v28 }
 0xc17   :  { %v447_v32 = vsel %vm446_vm8, %v1330_v25, %v443_v29 }
 0xc18   :  { %v452_v35 = vsel %vm449_vm9, %v451_v33, %v447_v32  ;;  %v1651_v32 = vld [vmem:[#allocation7 + $0x18] sm:$0xff]  ;;  %v1653_v33 = vld [vmem:[#allocation7 + $0x10] sm:$0xff] }
 0xc19   :  { %v455_v37 = vmul.f32 %v452_v35, %v400_v12  ;;  %704 = vmatpush.msra.mxu1 %v1651_v32  ;;  %767 = vmatpush.msrb.mxu2 %v1651_v32 }
 0xc1a   :  { %830 = vmatpush.msrb.mxu3 %v1651_v32 }
 0xc1b   :  { %705 = vmatpush.msra.mxu1 %v1653_v33  ;;  %768 = vmatpush.msrb.mxu2 %v1653_v33 }
 0xc1c   :  { %831 = vmatpush.msrb.mxu3 %v1653_v33 }
 0xc5e   :  { %v458_v34 = vpop.permute.xlu2 %457 }
 0xc5f   :  { %v460_v36 = vmul.f32 %v458_v34, %v452_v35 }
 0xc61   :  { %462 = vrot.lane.b32.xlu0 %v460_v36, %s1496_s23  ;;  %v1662_v36 = vld [vmem:[#allocation7 + $0x8] sm:$0xff] }
 0xc62   :  { %706 = vmatpush.msra.mxu1 %v1662_v36  ;;  %769 = vmatpush.msrb.mxu2 %v1662_v36 }
 0xc63   :  { %832 = vmatpush.msrb.mxu3 %v1662_v36 }
 0xcd3   :  { %v463_v38 = vpop.permute.xlu0 %462 }
 0xcd4   :  { %v465_v39 = vadd.f32 %v463_v38, %v455_v37  ;;  %v1667_v37 = vld [vmem:[#allocation7] sm:$0xff] }
 0xcd5   :  { %707 = vmatpush.msra.mxu1 %v1667_v37  ;;  %770 = vmatpush.msrb.mxu2 %v1667_v37 }
 0xcd6   :  { %1331 = vtanh.f32 %v465_v39  ;;  %833 = vmatpush.msrb.mxu3 %v1667_v37 }
 0xcdc   :  { %v1332_v40 = vpop.eup %1331 }
 0xcdd   :  { %468 = vrot.lane.b32.xlu1 %v1332_v40, %s1495_s1 }
 0xd4f   :  { %v469_v41 = vpop.permute.xlu1 %468 }
 0xd50   :  { %v471_v42 = vmul.f32 %v469_v41, %v452_v35 }
 0xd52   :  { %473 = vrot.lane.b32.xlu2 %v471_v42, %s1496_s23 }
 0xdac   :  { %v474_v43 = vpop.permute.xlu2 %473 }
 0xdad   :  { %476 = vst.msk [vmem:[#allocation2 + $0x28] sm:$0xff] %vm85_vm4, %v474_v43  ;;  %1243 = vmatmul.msk.f32.vlgmr.msra.gmra.mxu2 %vm85_vm4, %v474_v43  ;;  %v1700_v43 = vld [vmem:[%s1779_s4] ss:$0 sm:$0xff] }
 0xdae   :  { %956 = vmatpush.msra.mxu2 %v1651_v32 }
 0xdb0   :  { %957 = vmatpush.msra.mxu2 %v1653_v33 }
 0xdb2   :  { %958 = vmatpush.msra.mxu2 %v1662_v36 }
 0xdb4   :  { %v621_v44 = vld [vmem:[#allocation2 + $0x28] sm:$0xff]  ;;  %959 = vmatpush.msra.mxu2 %v1667_v37 }
 0xdb5   :  { %1252 = vmatmul.msk.f32.vlgmr.msrb.gmra.mxu1 %vm85_vm4, %v621_v44 }
 0xdb6   :  { %893 = vmatpush.msrb.mxu1 %v1651_v32 }
 0xdb8   :  { %894 = vmatpush.msrb.mxu1 %v1653_v33 }
 0xdba   :  { %895 = vmatpush.msrb.mxu1 %v1662_v36 }
 0xdbc   :  { %896 = vmatpush.msrb.mxu1 %v1667_v37 }
 0xe30   :  { %v496_v46 = vpop.f32.mrf.mxu2 }
 0xe31   :  { %v499_v47 = vadd.f32 %v496_v46, %v79_v45 }
 0xe32   :  { %v1691_v40 = vpop.f32.mrf.mxu1 }
 0xe33   :  { %1333 = vtanh.f32 %v499_v47  ;;  %v1244_v49 = vmul.f32 -1.442695, %v499_v47 }
 0xe35   :  { %1335 = vpow2.f32 %v1244_v49 }
 0xe39   :  { %v1334_v48 = vpop.eup %1333 }
 0xe3a   :  { %522 = vrot.lane.b32.xlu0 %v1334_v48, %s1495_s1 }
 0xe3b   :  { %v1336_v50 = vpop.eup %1335 }
 0xe3c   :  { %v503_v51 = vadd.f32 1.0, %v1336_v50 }
 0xe3e   :  { %1337 = vrcp.f32 %v503_v51  ;;  %v515_v57 = vand.u32 2147483648, %v503_v51  ;;  %vm509_vm11 = vweird.f32 %v503_v51  ;;  %v513_v58 = vand.u32 2147483647, %v503_v51 }
 0xe40   :  { %v516_v60 = vor.u32 1.1754944e-38, %v515_v57  ;;  %vm514_vm13 = vcmp.eq.f32.partialorder %v513_v58, 8.507059e+37 }
 0xe44   :  { %v1338_v52 = vpop.eup %1337 }
 0xe45   :  { %v505_v53 = vmul.f32 %v1338_v52, %v503_v51  ;;  %vm510_vm10 = vweird.f32 %v1338_v52 }
 0xe46   :  { %vm511_vm12 = vmor %vm509_vm11, %vm510_vm10 }
 0xe47   :  { %v506_v54 = vsub.f32 1.0, %v505_v53 }
 0xe49   :  { %v507_v55 = vmul.f32 %v1338_v52, %v506_v54 }
 0xe4b   :  { %v508_v56 = vadd.f32 %v1338_v52, %v507_v55 }
 0xe4d   :  { %v512_v59 = vsel %vm511_vm12, %v1338_v52, %v508_v56 }
 0xe4e   :  { %v517_v62 = vsel %vm514_vm13, %v516_v60, %v512_v59 }
 0xe4f   :  { %v520_v0 = vmul.f32 %v517_v62, %v465_v39 }
 0xeac   :  { %v523_v61 = vpop.permute.xlu0 %522 }
 0xead   :  { %v525_v63 = vmul.f32 %v523_v61, %v517_v62 }
 0xeaf   :  { %527 = vrot.lane.b32.xlu1 %v525_v63, %s1496_s23 }
 0xf21   :  { %v528_v1 = vpop.permute.xlu1 %527 }
 0xf22   :  { %v530_v2 = vadd.f32 %v528_v1, %v520_v0 }
 0xf24   :  { %1339 = vtanh.f32 %v530_v2 }
 0xf2a   :  { %v1340_v3 = vpop.eup %1339 }
 0xf2b   :  { %533 = vrot.lane.b32.xlu2 %v1340_v3, %s1495_s1 }
 0xf85   :  { %v534_v5 = vpop.permute.xlu2 %533 }
 0xf86   :  { %v536_v6 = vmul.f32 %v534_v5, %v517_v62 }
 0xf88   :  { %538 = vrot.lane.b32.xlu0 %v536_v6, %s1496_s23 }
 0xffa   :  { %v539_v7 = vpop.permute.xlu0 %538 }
 0xffb   :  { %541 = vst.msk [vmem:[#allocation2 + $0x30] sm:$0xff] %vm85_vm4, %v539_v7  ;;  %1245 = vmatmul.msk.f32.vlgmr.msra.gmra.mxu3 %vm85_vm4, %v539_v7 }
 0xffc   :  { %1019 = vmatpush.msra.mxu3 %v1651_v32 }
 0xffe   :  { %1020 = vmatpush.msra.mxu3 %v1653_v33 }
0x1000   :  { %1021 = vmatpush.msra.mxu3 %v1662_v36 }
0x1002   :  { %v622_v8 = vld [vmem:[#allocation2 + $0x30] sm:$0xff]  ;;  %1022 = vmatpush.msra.mxu3 %v1667_v37 }
0x1003   :  { %1253 = vmatmul.msk.f32.gmra.mxu1 %vm85_vm4, %v622_v8 }
0x107e   :  { %v561_v10 = vpop.f32.mrf.mxu3 }
0x107f   :  { %v564_v11 = vadd.f32 %v561_v10, %v80_v9 }
0x1080   :  { %v1693_v41 = vpop.f32.mrf.mxu1 }
0x1081   :  { %1341 = vtanh.f32 %v564_v11  ;;  %v1246_v13 = vmul.f32 -1.442695, %v564_v11 }
0x1083   :  { %1343 = vpow2.f32 %v1246_v13 }
0x1087   :  { %v1342_v12 = vpop.eup %1341 }
0x1088   :  { %587 = vrot.lane.b32.xlu1 %v1342_v12, %s1495_s1 }
0x1089   :  { %v1344_v14 = vpop.eup %1343 }
0x108a   :  { %v568_v15 = vadd.f32 1.0, %v1344_v14 }
0x108c   :  { %1345 = vrcp.f32 %v568_v15  ;;  %v580_v21 = vand.u32 2147483648, %v568_v15  ;;  %vm574_vm15 = vweird.f32 %v568_v15  ;;  %v578_v22 = vand.u32 2147483647, %v568_v15 }
0x108e   :  { %v581_v24 = vor.u32 1.1754944e-38, %v580_v21  ;;  %vm579_vm1 = vcmp.eq.f32.partialorder %v578_v22, 8.507059e+37 }
0x1092   :  { %v1346_v16 = vpop.eup %1345 }
0x1093   :  { %v570_v17 = vmul.f32 %v1346_v16, %v568_v15  ;;  %vm575_vm14 = vweird.f32 %v1346_v16 }
0x1094   :  { %vm576_vm0 = vmor %vm574_vm15, %vm575_vm14 }
0x1095   :  { %v571_v18 = vsub.f32 1.0, %v570_v17 }
0x1097   :  { %v572_v19 = vmul.f32 %v1346_v16, %v571_v18 }
0x1099   :  { %v573_v20 = vadd.f32 %v1346_v16, %v572_v19 }
0x109b   :  { %v577_v23 = vsel %vm576_vm0, %v1346_v16, %v573_v20 }
0x109c   :  { %v582_v26 = vsel %vm579_vm1, %v581_v24, %v577_v23 }
0x109d   :  { %v585_v28 = vmul.f32 %v582_v26, %v530_v2 }
0x10fa   :  { %v588_v25 = vpop.permute.xlu1 %587 }
0x10fb   :  { %v590_v27 = vmul.f32 %v588_v25, %v582_v26 }
0x10fd   :  { %592 = vrot.lane.b32.xlu2 %v590_v27, %s1496_s23 }
0x1157   :  { %v593_v29 = vpop.permute.xlu2 %592 }
0x1158   :  { %v595_v30 = vadd.f32 %v593_v29, %v585_v28 }
0x115a   :  { %1347 = vtanh.f32 %v595_v30 }
0x1160   :  { %v1348_v31 = vpop.eup %1347 }
0x1161   :  { %598 = vrot.lane.b32.xlu0 %v1348_v31, %s1495_s1 }
0x11d3   :  { %v599_v34 = vpop.permute.xlu0 %598 }
0x11d4   :  { %v601_v35 = vmul.f32 %v599_v34, %v582_v26 }
0x11d6   :  { %603 = vrot.lane.b32.xlu1 %v601_v35, %s1496_s23 }
0x1248   :  { %v604_v38 = vpop.permute.xlu1 %603 }
0x1249   :  { %606 = vst.msk [vmem:[#allocation2 + $0x38] sm:$0xff] %vm85_vm4, %v604_v38 }
0x1250   :  { %v623_v39 = vld [vmem:[#allocation2 + $0x38] sm:$0xff] }
0x1251   :  { %1254 = vmatmul.msk.f32.gmra.mxu1 %vm85_vm4, %v623_v39 }
0x1259   :  { %708 = vmatmul.f32.vlgmr.msra.gmra.mxu1 %v1494_v4  ;;  %v668_v4 = vpop.f32.mrf.mxu0 }
0x125a   :  { %1082 = vmatpush.msra.mxu1 %v1651_v32  ;;  %v669_v44 = vadd.f32 %v1700_v43, %v668_v4 }
0x125c   :  { %1083 = vmatpush.msra.mxu1 %v1653_v33 }
0x125e   :  { %1084 = vmatpush.msra.mxu1 %v1662_v36 }
0x1260   :  { %1085 = vmatpush.msra.mxu1 %v1667_v37 }
0x1261   :  { %v671_v7 = vpop.f32.mrf.mxu0 }
0x1262   :  { %v672_v8 = vadd.f32 %v1700_v43, %v671_v7 }
0x1269   :  { %v674_v34 = vpop.f32.mrf.mxu0 }
0x126a   :  { %v675_v35 = vadd.f32 %v1700_v43, %v674_v34 }
0x12ce   :  { %v1695_v42 = vpop.f32.mrf.mxu1 }
0x12d6   :  { %v709_v45 = vpop.f32.mrf.mxu1 }
0x12d7   :  { %v712_v46 = vadd.f32 %v709_v45, %v669_v44 }
0x12d9   :  { %1349 = vtanh.f32 %v712_v46  ;;  %v1255_v48 = vmul.f32 -1.442695, %v712_v46 }
0x12db   :  { %1351 = vpow2.f32 %v1255_v48 }
0x12df   :  { %v1350_v47 = vpop.eup %1349 }
0x12e0   :  { %735 = vrot.lane.b32.xlu2 %v1350_v47, %s1495_s1 }
0x12e1   :  { %v1352_v49 = vpop.eup %1351 }
0x12e2   :  { %v716_v50 = vadd.f32 1.0, %v1352_v49 }
0x12e4   :  { %1353 = vrcp.f32 %v716_v50  ;;  %v728_v56 = vand.u32 2147483648, %v716_v50  ;;  %vm722_vm3 = vweird.f32 %v716_v50  ;;  %v726_v57 = vand.u32 2147483647, %v716_v50 }
0x12e6   :  { %v729_v59 = vor.u32 1.1754944e-38, %v728_v56  ;;  %vm727_vm6 = vcmp.eq.f32.partialorder %v726_v57, 8.507059e+37 }
0x12ea   :  { %v1354_v51 = vpop.eup %1353 }
0x12eb   :  { %v718_v52 = vmul.f32 %v1354_v51, %v716_v50  ;;  %vm723_vm2 = vweird.f32 %v1354_v51 }
0x12ec   :  { %vm724_vm5 = vmor %vm722_vm3, %vm723_vm2 }
0x12ed   :  { %v719_v53 = vsub.f32 1.0, %v718_v52 }
0x12ef   :  { %v720_v54 = vmul.f32 %v1354_v51, %v719_v53 }
0x12f1   :  { %v721_v55 = vadd.f32 %v1354_v51, %v720_v54 }
0x12f3   :  { %v725_v58 = vsel %vm724_vm5, %v1354_v51, %v721_v55 }
0x12f4   :  { %v730_v61 = vsel %vm727_vm6, %v729_v59, %v725_v58 }
0x12f5   :  { %v733_v63 = vmul.f32 0.0, %v730_v61 }
0x133a   :  { %v736_v60 = vpop.permute.xlu2 %735 }
0x133b   :  { %v738_v62 = vmul.f32 %v736_v60, %v730_v61 }
0x133d   :  { %740 = vrot.lane.b32.xlu0 %v738_v62, %s1496_s23 }
0x13af   :  { %v741_v0 = vpop.permute.xlu0 %740 }
0x13b0   :  { %v743_v1 = vadd.f32 %v741_v0, %v733_v63  ;;  %v677_v0 = vpop.f32.mrf.mxu0 }
0x13b2   :  { %1355 = vtanh.f32 %v743_v1 }
0x13b8   :  { %v1356_v2 = vpop.eup %1355 }
0x13b9   :  { %746 = vrot.lane.b32.xlu1 %v1356_v2, %s1495_s1 }
0x142b   :  { %v747_v3 = vpop.permute.xlu1 %746 }
0x142c   :  { %v749_v5 = vmul.f32 %v747_v3, %v730_v61 }
0x142e   :  { %751 = vrot.lane.b32.xlu2 %v749_v5, %s1496_s23 }
0x1488   :  { %v752_v6 = vpop.permute.xlu2 %751 }
0x1489   :  { %1256 = vmatmul.msk.f32.vlgmr.msrb.gmra.mxu2 %vm85_vm4, %v752_v6 }
0x148a   :  { %1145 = vmatpush.msrb.mxu2 %v1651_v32 }
0x148c   :  { %1146 = vmatpush.msrb.mxu2 %v1653_v33 }
0x148e   :  { %1147 = vmatpush.msrb.mxu2 %v1662_v36 }
0x1490   :  { %1148 = vmatpush.msrb.mxu2 %v1667_v37 }
0x150c   :  { %v772_v9 = vpop.f32.mrf.mxu2 }
0x150d   :  { %v775_v10 = vadd.f32 %v772_v9, %v672_v8 }
0x150f   :  { %1357 = vtanh.f32 %v775_v10  ;;  %v1257_v12 = vmul.f32 -1.442695, %v775_v10 }
0x1511   :  { %1359 = vpow2.f32 %v1257_v12 }
0x1515   :  { %v1358_v11 = vpop.eup %1357 }
0x1516   :  { %798 = vrot.lane.b32.xlu0 %v1358_v11, %s1495_s1 }
0x1517   :  { %v1360_v13 = vpop.eup %1359 }
0x1518   :  { %v779_v14 = vadd.f32 1.0, %v1360_v13 }
0x151a   :  { %1361 = vrcp.f32 %v779_v14  ;;  %v791_v20 = vand.u32 2147483648, %v779_v14  ;;  %vm785_vm8 = vweird.f32 %v779_v14  ;;  %v789_v21 = vand.u32 2147483647, %v779_v14 }
0x151c   :  { %v792_v23 = vor.u32 1.1754944e-38, %v791_v20  ;;  %vm790_vm10 = vcmp.eq.f32.partialorder %v789_v21, 8.507059e+37 }
0x1520   :  { %v1362_v15 = vpop.eup %1361 }
0x1521   :  { %v781_v16 = vmul.f32 %v1362_v15, %v779_v14  ;;  %vm786_vm7 = vweird.f32 %v1362_v15 }
0x1522   :  { %vm787_vm9 = vmor %vm785_vm8, %vm786_vm7 }
0x1523   :  { %v782_v17 = vsub.f32 1.0, %v781_v16 }
0x1525   :  { %v783_v18 = vmul.f32 %v1362_v15, %v782_v17 }
0x1527   :  { %v784_v19 = vadd.f32 %v1362_v15, %v783_v18 }
0x1529   :  { %v788_v22 = vsel %vm787_vm9, %v1362_v15, %v784_v19 }
0x152a   :  { %v793_v25 = vsel %vm790_vm10, %v792_v23, %v788_v22 }
0x152b   :  { %v796_v27 = vmul.f32 %v793_v25, %v743_v1  ;;  %v678_v1 = vadd.f32 %v1700_v43, %v677_v0 }
0x1588   :  { %v799_v24 = vpop.permute.xlu0 %798 }
0x1589   :  { %v801_v26 = vmul.f32 %v799_v24, %v793_v25 }
0x158b   :  { %803 = vrot.lane.b32.xlu1 %v801_v26, %s1496_s23 }
0x15fd   :  { %v804_v28 = vpop.permute.xlu1 %803 }
0x15fe   :  { %v806_v29 = vadd.f32 %v804_v28, %v796_v27  ;;  %v680_v28 = vpop.f32.mrf.mxu0 }
0x1600   :  { %1363 = vtanh.f32 %v806_v29 }
0x1606   :  { %v1364_v30 = vpop.eup %1363 }
0x1607   :  { %809 = vrot.lane.b32.xlu2 %v1364_v30, %s1495_s1 }
0x1661   :  { %v810_v31 = vpop.permute.xlu2 %809 }
0x1662   :  { %v812_v32 = vmul.f32 %v810_v31, %v793_v25 }
0x1664   :  { %814 = vrot.lane.b32.xlu0 %v812_v32, %s1496_s23 }
0x16d6   :  { %v815_v33 = vpop.permute.xlu0 %814 }
0x16d7   :  { %1258 = vmatmul.msk.f32.vlgmr.msrb.gmra.mxu3 %vm85_vm4, %v815_v33 }
0x175a   :  { %v835_v36 = vpop.f32.mrf.mxu3 }
0x175b   :  { %v838_v37 = vadd.f32 %v835_v36, %v675_v35 }
0x175d   :  { %1365 = vtanh.f32 %v838_v37  ;;  %v1259_v39 = vmul.f32 -1.442695, %v838_v37 }
0x175f   :  { %1367 = vpow2.f32 %v1259_v39 }
0x1763   :  { %v1366_v38 = vpop.eup %1365 }
0x1764   :  { %861 = vrot.lane.b32.xlu1 %v1366_v38, %s1495_s1 }
0x1765   :  { %v1368_v4 = vpop.eup %1367 }
0x1766   :  { %v842_v44 = vadd.f32 1.0, %v1368_v4 }
0x1768   :  { %1369 = vrcp.f32 %v842_v44  ;;  %v854_v50 = vand.u32 2147483648, %v842_v44  ;;  %vm848_vm12 = vweird.f32 %v842_v44  ;;  %v852_v51 = vand.u32 2147483647, %v842_v44 }
0x176a   :  { %v855_v53 = vor.u32 1.1754944e-38, %v854_v50  ;;  %vm853_vm14 = vcmp.eq.f32.partialorder %v852_v51, 8.507059e+37 }
0x176e   :  { %v1370_v45 = vpop.eup %1369 }
0x176f   :  { %v844_v46 = vmul.f32 %v1370_v45, %v842_v44  ;;  %vm849_vm11 = vweird.f32 %v1370_v45 }
0x1770   :  { %vm850_vm13 = vmor %vm848_vm12, %vm849_vm11 }
0x1771   :  { %v845_v47 = vsub.f32 1.0, %v844_v46 }
0x1773   :  { %v846_v48 = vmul.f32 %v1370_v45, %v845_v47 }
0x1775   :  { %v847_v49 = vadd.f32 %v1370_v45, %v846_v48 }
0x1777   :  { %v851_v52 = vsel %vm850_vm13, %v1370_v45, %v847_v49 }
0x1778   :  { %v856_v55 = vsel %vm853_vm14, %v855_v53, %v851_v52 }
0x1779   :  { %v859_v57 = vmul.f32 %v856_v55, %v806_v29  ;;  %v681_v29 = vadd.f32 %v1700_v43, %v680_v28 }
0x17d6   :  { %v862_v54 = vpop.permute.xlu1 %861 }
0x17d7   :  { %v864_v56 = vmul.f32 %v862_v54, %v856_v55 }
0x17d9   :  { %866 = vrot.lane.b32.xlu2 %v864_v56, %s1496_s23 }
0x1833   :  { %v867_v58 = vpop.permute.xlu2 %866 }
0x1834   :  { %v869_v59 = vadd.f32 %v867_v58, %v859_v57  ;;  %v684_v58 = vadd.f32 %v1700_v43, %v1691_v40 }
0x1836   :  { %1371 = vtanh.f32 %v869_v59 }
0x183c   :  { %v1372_v60 = vpop.eup %1371 }
0x183d   :  { %872 = vrot.lane.b32.xlu0 %v1372_v60, %s1495_s1 }
0x18af   :  { %v873_v61 = vpop.permute.xlu0 %872 }
0x18b0   :  { %v875_v62 = vmul.f32 %v873_v61, %v856_v55 }
0x18b2   :  { %877 = vrot.lane.b32.xlu1 %v875_v62, %s1496_s23 }
0x1924   :  { %v878_v63 = vpop.permute.xlu1 %877 }
0x1925   :  { %1260 = vmatmul.msk.f32.vlgmr.msrb.gmra.mxu1 %vm85_vm4, %v878_v63 }
0x19a2   :  { %v898_v2 = vpop.f32.mrf.mxu1 }
0x19a3   :  { %v901_v3 = vadd.f32 %v898_v2, %v678_v1 }
0x19a5   :  { %1373 = vtanh.f32 %v901_v3  ;;  %v1261_v6 = vmul.f32 -1.442695, %v901_v3 }
0x19a7   :  { %1375 = vpow2.f32 %v1261_v6 }
0x19ab   :  { %v1374_v5 = vpop.eup %1373 }
0x19ac   :  { %924 = vrot.lane.b32.xlu2 %v1374_v5, %s1495_s1 }
0x19ad   :  { %v1376_v7 = vpop.eup %1375 }
0x19ae   :  { %v905_v8 = vadd.f32 1.0, %v1376_v7 }
0x19b0   :  { %1377 = vrcp.f32 %v905_v8  ;;  %v917_v14 = vand.u32 2147483648, %v905_v8  ;;  %vm911_vm0 = vweird.f32 %v905_v8  ;;  %v915_v15 = vand.u32 2147483647, %v905_v8 }
0x19b2   :  { %v918_v17 = vor.u32 1.1754944e-38, %v917_v14  ;;  %vm916_vm2 = vcmp.eq.f32.partialorder %v915_v15, 8.507059e+37 }
0x19b6   :  { %v1378_v9 = vpop.eup %1377 }
0x19b7   :  { %v907_v10 = vmul.f32 %v1378_v9, %v905_v8  ;;  %vm912_vm15 = vweird.f32 %v1378_v9 }
0x19b8   :  { %vm913_vm1 = vmor %vm911_vm0, %vm912_vm15 }
0x19b9   :  { %v908_v11 = vsub.f32 1.0, %v907_v10 }
0x19bb   :  { %v909_v12 = vmul.f32 %v1378_v9, %v908_v11 }
0x19bd   :  { %v910_v13 = vadd.f32 %v1378_v9, %v909_v12 }
0x19bf   :  { %v914_v16 = vsel %vm913_vm1, %v1378_v9, %v910_v13 }
0x19c0   :  { %v919_v19 = vsel %vm916_vm2, %v918_v17, %v914_v16 }
0x19c1   :  { %v922_v21 = vmul.f32 %v919_v19, %v869_v59 }
0x1a06   :  { %v925_v18 = vpop.permute.xlu2 %924 }
0x1a07   :  { %v927_v20 = vmul.f32 %v925_v18, %v919_v19 }
0x1a09   :  { %929 = vrot.lane.b32.xlu0 %v927_v20, %s1496_s23  ;;  %v687_v20 = vadd.f32 %v1700_v43, %v1693_v41 }
0x1a7b   :  { %v930_v22 = vpop.permute.xlu0 %929 }
0x1a7c   :  { %v932_v23 = vadd.f32 %v930_v22, %v922_v21 }
0x1a7e   :  { %1379 = vtanh.f32 %v932_v23 }
0x1a84   :  { %v1380_v24 = vpop.eup %1379 }
0x1a85   :  { %935 = vrot.lane.b32.xlu1 %v1380_v24, %s1495_s1 }
0x1af7   :  { %v936_v25 = vpop.permute.xlu1 %935 }
0x1af8   :  { %v938_v26 = vmul.f32 %v936_v25, %v919_v19 }
0x1afa   :  { %940 = vrot.lane.b32.xlu2 %v938_v26, %s1496_s23 }
0x1b54   :  { %v941_v27 = vpop.permute.xlu2 %940 }
0x1b55   :  { %1262 = vmatmul.msk.f32.vlgmr.msra.gmra.mxu2 %vm85_vm4, %v941_v27 }
0x1bd8   :  { %v961_v30 = vpop.f32.mrf.mxu2 }
0x1bd9   :  { %v964_v31 = vadd.f32 %v961_v30, %v681_v29 }
0x1bdb   :  { %1381 = vtanh.f32 %v964_v31  ;;  %v1263_v33 = vmul.f32 -1.442695, %v964_v31 }
0x1bdd   :  { %1383 = vpow2.f32 %v1263_v33 }
0x1be1   :  { %v1382_v32 = vpop.eup %1381 }
0x1be2   :  { %987 = vrot.lane.b32.xlu0 %v1382_v32, %s1495_s1 }
0x1be3   :  { %v1384_v34 = vpop.eup %1383 }
0x1be4   :  { %v968_v35 = vadd.f32 1.0, %v1384_v34 }
0x1be6   :  { %1385 = vrcp.f32 %v968_v35  ;;  %v980_v44 = vand.u32 2147483648, %v968_v35  ;;  %vm974_vm5 = vweird.f32 %v968_v35  ;;  %v978_v45 = vand.u32 2147483647, %v968_v35 }
0x1be8   :  { %v981_v47 = vor.u32 1.1754944e-38, %v980_v44  ;;  %vm979_vm7 = vcmp.eq.f32.partialorder %v978_v45, 8.507059e+37 }
0x1bec   :  { %v1386_v36 = vpop.eup %1385 }
0x1bed   :  { %v970_v37 = vmul.f32 %v1386_v36, %v968_v35  ;;  %vm975_vm3 = vweird.f32 %v1386_v36 }
0x1bee   :  { %vm976_vm6 = vmor %vm974_vm5, %vm975_vm3  ;;  %vm1224_vm5 = vcmask 31744  }
0x1bef   :  { %v971_v38 = vsub.f32 1.0, %v970_v37 }
0x1bf1   :  { %v972_v39 = vmul.f32 %v1386_v36, %v971_v38 }
0x1bf3   :  { %v973_v4 = vadd.f32 %v1386_v36, %v972_v39 }
0x1bf5   :  { %v977_v46 = vsel %vm976_vm6, %v1386_v36, %v973_v4 }
0x1bf6   :  { %v982_v49 = vsel %vm979_vm7, %v981_v47, %v977_v46 }
0x1bf7   :  { %v985_v51 = vmul.f32 %v982_v49, %v932_v23 }
0x1c54   :  { %v988_v48 = vpop.permute.xlu0 %987 }
0x1c55   :  { %v990_v50 = vmul.f32 %v988_v48, %v982_v49  ;;  %v690_v48 = vadd.f32 %v1700_v43, %v1695_v42 }
0x1c57   :  { %992 = vrot.lane.b32.xlu1 %v990_v50, %s1496_s23 }
0x1cc9   :  { %v993_v52 = vpop.permute.xlu1 %992 }
0x1cca   :  { %v995_v53 = vadd.f32 %v993_v52, %v985_v51 }
0x1ccc   :  { %1387 = vtanh.f32 %v995_v53 }
0x1cd2   :  { %v1388_v54 = vpop.eup %1387 }
0x1cd3   :  { %998 = vrot.lane.b32.xlu2 %v1388_v54, %s1495_s1 }
0x1d2d   :  { %v999_v55 = vpop.permute.xlu2 %998 }
0x1d2e   :  { %v1001_v56 = vmul.f32 %v999_v55, %v982_v49 }
0x1d30   :  { %1003 = vrot.lane.b32.xlu0 %v1001_v56, %s1496_s23 }
0x1da2   :  { %v1004_v57 = vpop.permute.xlu0 %1003 }
0x1da3   :  { %1264 = vmatmul.msk.f32.vlgmr.msra.gmra.mxu3 %vm85_vm4, %v1004_v57 }
0x1e26   :  { %v1024_v59 = vpop.f32.mrf.mxu3 }
0x1e27   :  { %v1027_v60 = vadd.f32 %v1024_v59, %v684_v58 }
0x1e29   :  { %1389 = vtanh.f32 %v1027_v60  ;;  %v1265_v62 = vmul.f32 -1.442695, %v1027_v60 }
0x1e2b   :  { %1391 = vpow2.f32 %v1265_v62 }
0x1e2f   :  { %v1390_v61 = vpop.eup %1389 }
0x1e30   :  { %1050 = vrot.lane.b32.xlu1 %v1390_v61, %s1495_s1 }
0x1e31   :  { %v1392_v63 = vpop.eup %1391 }
0x1e32   :  { %v1031_v0 = vadd.f32 1.0, %v1392_v63 }
0x1e34   :  { %1393 = vrcp.f32 %v1031_v0  ;;  %v1043_v7 = vand.u32 2147483648, %v1031_v0  ;;  %vm1037_vm9 = vweird.f32 %v1031_v0  ;;  %v1041_v40 = vand.u32 2147483647, %v1031_v0 }
0x1e36   :  { %v1044_v9 = vor.u32 1.1754944e-38, %v1043_v7  ;;  %vm1042_vm11 = vcmp.eq.f32.partialorder %v1041_v40, 8.507059e+37  ;;  %v1193_v7 = vld [vmem:[%s1780_s5 + $0x10] sm:$0xff]  ;;  %v1192_v40 = vld [vmem:[%s1780_s5 + $0x8] sm:$0xff] }
0x1e3a   :  { %v1394_v1 = vpop.eup %1393 }
0x1e3b   :  { %v1033_v2 = vmul.f32 %v1394_v1, %v1031_v0  ;;  %vm1038_vm8 = vweird.f32 %v1394_v1 }
0x1e3c   :  { %vm1039_vm10 = vmor %vm1037_vm9, %vm1038_vm8 }
0x1e3d   :  { %v1034_v3 = vsub.f32 1.0, %v1033_v2 }
0x1e3f   :  { %v1035_v5 = vmul.f32 %v1394_v1, %v1034_v3 }
0x1e41   :  { %v1036_v6 = vadd.f32 %v1394_v1, %v1035_v5 }
0x1e43   :  { %v1040_v8 = vsel %vm1039_vm10, %v1394_v1, %v1036_v6  ;;  %v1194_v6 = vld [vmem:[%s1780_s5 + $0x18] sm:$0xff] }
0x1e44   :  { %v1045_v11 = vsel %vm1042_vm11, %v1044_v9, %v1040_v8  ;;  %1216 = vmatpush.msrb.mxu3 %v1194_v6  ;;  %v1191_v8 = vld [vmem:[%s1780_s5] sm:$0xff] }
0x1e45   :  { %v1048_v13 = vmul.f32 %v1045_v11, %v995_v53 }
0x1e46   :  { %1217 = vmatpush.msrb.mxu3 %v1193_v7 }
0x1e48   :  { %1218 = vmatpush.msrb.mxu3 %v1192_v40 }
0x1e4a   :  { %1219 = vmatpush.msrb.mxu3 %v1191_v8 }
0x1ea2   :  { %v1051_v10 = vpop.permute.xlu1 %1050 }
0x1ea3   :  { %v1053_v12 = vmul.f32 %v1051_v10, %v1045_v11 }
0x1ea5   :  { %1055 = vrot.lane.b32.xlu2 %v1053_v12, %s1496_s23  ;;  %v1284_v12 = vld [vmem:[%s1781_s6] ss:$0 sm:$0xff] }
0x1eff   :  { %v1056_v14 = vpop.permute.xlu2 %1055 }
0x1f00   :  { %v1058_v15 = vadd.f32 %v1056_v14, %v1048_v13 }
0x1f02   :  { %1395 = vtanh.f32 %v1058_v15 }
0x1f08   :  { %v1396_v16 = vpop.eup %1395 }
0x1f09   :  { %1061 = vrot.lane.b32.xlu0 %v1396_v16, %s1495_s1 }
0x1f7b   :  { %v1062_v17 = vpop.permute.xlu0 %1061 }
0x1f7c   :  { %v1064_v18 = vmul.f32 %v1062_v17, %v1045_v11 }
0x1f7e   :  { %1066 = vrot.lane.b32.xlu1 %v1064_v18, %s1496_s23 }
0x1ff0   :  { %v1067_v19 = vpop.permute.xlu1 %1066 }
0x1ff1   :  { %1266 = vmatmul.msk.f32.vlgmr.msra.gmra.mxu1 %vm85_vm4, %v1067_v19 }
0x206e   :  { %v1087_v21 = vpop.f32.mrf.mxu1 }
0x206f   :  { %v1090_v22 = vadd.f32 %v1087_v21, %v687_v20 }
0x2071   :  { %1397 = vtanh.f32 %v1090_v22  ;;  %v1267_v24 = vmul.f32 -1.442695, %v1090_v22 }
0x2073   :  { %1399 = vpow2.f32 %v1267_v24 }
0x2077   :  { %v1398_v23 = vpop.eup %1397 }
0x2078   :  { %1113 = vrot.lane.b32.xlu2 %v1398_v23, %s1495_s1 }
0x2079   :  { %v1400_v25 = vpop.eup %1399 }
0x207a   :  { %v1094_v26 = vadd.f32 1.0, %v1400_v25 }
0x207c   :  { %1401 = vrcp.f32 %v1094_v26  ;;  %v1106_v32 = vand.u32 2147483648, %v1094_v26  ;;  %vm1100_vm13 = vweird.f32 %v1094_v26  ;;  %v1104_v41 = vand.u32 2147483647, %v1094_v26 }
0x207e   :  { %v1107_v34 = vor.u32 1.1754944e-38, %v1106_v32  ;;  %vm1105_vm15 = vcmp.eq.f32.partialorder %v1104_v41, 8.507059e+37 }
0x2082   :  { %v1402_v27 = vpop.eup %1401 }
0x2083   :  { %v1096_v28 = vmul.f32 %v1402_v27, %v1094_v26  ;;  %vm1101_vm12 = vweird.f32 %v1402_v27 }
0x2084   :  { %vm1102_vm14 = vmor %vm1100_vm13, %vm1101_vm12 }
0x2085   :  { %v1097_v29 = vsub.f32 1.0, %v1096_v28 }
0x2087   :  { %v1098_v30 = vmul.f32 %v1402_v27, %v1097_v29 }
0x2089   :  { %v1099_v31 = vadd.f32 %v1402_v27, %v1098_v30 }
0x208b   :  { %v1103_v33 = vsel %vm1102_vm14, %v1402_v27, %v1099_v31 }
0x208c   :  { %v1108_v36 = vsel %vm1105_vm15, %v1107_v34, %v1103_v33 }
0x208d   :  { %v1111_v38 = vmul.f32 %v1108_v36, %v1058_v15 }
0x20d2   :  { %v1114_v35 = vpop.permute.xlu2 %1113 }
0x20d3   :  { %v1116_v37 = vmul.f32 %v1114_v35, %v1108_v36 }
0x20d5   :  { %1118 = vrot.lane.b32.xlu0 %v1116_v37, %s1496_s23 }
0x2147   :  { %v1119_v39 = vpop.permute.xlu0 %1118 }
0x2148   :  { %v1121_v4 = vadd.f32 %v1119_v39, %v1111_v38 }
0x214a   :  { %1403 = vtanh.f32 %v1121_v4 }
0x2150   :  { %v1404_v44 = vpop.eup %1403 }
0x2151   :  { %1124 = vrot.lane.b32.xlu1 %v1404_v44, %s1495_s1 }
0x21c3   :  { %v1125_v45 = vpop.permute.xlu1 %1124 }
0x21c4   :  { %v1127_v46 = vmul.f32 %v1125_v45, %v1108_v36 }
0x21c6   :  { %1129 = vrot.lane.b32.xlu2 %v1127_v46, %s1496_s23 }
0x2220   :  { %v1130_v47 = vpop.permute.xlu2 %1129 }
0x2221   :  { %1268 = vmatmul.msk.f32.vlgmr.msrb.gmra.mxu2 %vm85_vm4, %v1130_v47 }
0x22a4   :  { %v1150_v49 = vpop.f32.mrf.mxu2 }
0x22a5   :  { %v1153_v50 = vadd.f32 %v1150_v49, %v690_v48 }
0x22a7   :  { %1405 = vtanh.f32 %v1153_v50  ;;  %v1269_v52 = vmul.f32 -1.442695, %v1153_v50 }
0x22a9   :  { %1407 = vpow2.f32 %v1269_v52 }
0x22ad   :  { %v1406_v51 = vpop.eup %1405 }
0x22ae   :  { %1176 = vrot.lane.b32.xlu0 %v1406_v51, %s1495_s1 }
0x22af   :  { %v1408_v53 = vpop.eup %1407 }
0x22b0   :  { %v1157_v54 = vadd.f32 1.0, %v1408_v53 }
0x22b2   :  { %1409 = vrcp.f32 %v1157_v54  ;;  %v1169_v60 = vand.u32 2147483648, %v1157_v54  ;;  %vm1163_vm1 = vweird.f32 %v1157_v54  ;;  %v1167_v42 = vand.u32 2147483647, %v1157_v54 }
0x22b4   :  { %v1170_v61 = vor.u32 1.1754944e-38, %v1169_v60  ;;  %vm1168_vm3 = vcmp.eq.f32.partialorder %v1167_v42, 8.507059e+37 }
0x22b8   :  { %v1410_v55 = vpop.eup %1409 }
0x22b9   :  { %v1159_v56 = vmul.f32 %v1410_v55, %v1157_v54  ;;  %vm1164_vm0 = vweird.f32 %v1410_v55 }
0x22ba   :  { %vm1165_vm2 = vmor %vm1163_vm1, %vm1164_vm0 }
0x22bb   :  { %v1160_v57 = vsub.f32 1.0, %v1159_v56 }
0x22bd   :  { %v1161_v58 = vmul.f32 %v1410_v55, %v1160_v57 }
0x22bf   :  { %v1162_v59 = vadd.f32 %v1410_v55, %v1161_v58 }
0x22c1   :  { %v1166_v43 = vsel %vm1165_vm2, %v1410_v55, %v1162_v59 }
0x22c2   :  { %v1171_v63 = vsel %vm1168_vm3, %v1170_v61, %v1166_v43 }
0x22c3   :  { %v1174_v1 = vmul.f32 %v1171_v63, %v1121_v4 }
0x2320   :  { %v1177_v62 = vpop.permute.xlu0 %1176 }
0x2321   :  { %v1179_v0 = vmul.f32 %v1177_v62, %v1171_v63 }
0x2323   :  { %1181 = vrot.lane.b32.xlu1 %v1179_v0, %s1496_s23 }
0x2395   :  { %v1182_v2 = vpop.permute.xlu1 %1181 }
0x2396   :  { %v1184_v3 = vadd.f32 %v1182_v2, %v1174_v1 }
0x2398   :  { %1411 = vtanh.f32 %v1184_v3 }
0x239e   :  { %v1412_v5 = vpop.eup %1411 }
0x239f   :  { %1187 = vrot.lane.b32.xlu2 %v1412_v5, %s1495_s1 }
0x23f9   :  { %v1188_v9 = vpop.permute.xlu2 %1187 }
0x23fa   :  { %v1190_v10 = vmul.f32 %v1188_v9, %v1171_v63 }
0x23fc   :  { %1200 = vrot.lane.b32.xlu0 %v1190_v10, %s1496_s23 }
0x246e   :  { %v1201_v11 = vpop.permute.xlu0 %1200 }
0x246f   :  { %1270 = vmatmul.msk.f32.vlgmr.msrb.gmra.mxu3 %vm85_vm4, %v1201_v11 }
0x24f2   :  { %v1221_v13 = vpop.f32.mrf.mxu3 }
0x24f3   :  { %v1222_v14 = vadd.f32 %v1284_v12, %v1221_v13 }
0x24f5   :  { %1225 = vst.msk [vmem:[%s1782_s7] sm:$0xff] %vm1224_vm5, %v1222_v14 }
0x24f6   :  { %1230 = vsyncpa [#allocation4], 1 }
0x24f7   :  { %1231 = vsyncpa [#allocation6], 1 }

</bundles_post_ra>
